<compile_context>
chip_gen: v7x
topology: tpu7x:2x2x1
jax: 0.10.0
libtpu: 0.0.40
codegen_flags: <defaults>
</compile_context>

<pallas_src>
import functools

import jax
import jax.numpy as jnp
import numpy as np
from jax.experimental import pallas as pl
from jax.experimental.pallas import tpu as pltpu

_LANES = 128


# ---------------------------------------------------------------------------
# Kernel 1: streaming per-class soft-dice statistics (per batch element).
# ---------------------------------------------------------------------------
def _make_stats_kernel(C, R, T, HW):
    # The last row-tile needs masking iff it covers pixel indices >= HW.
    needs_tail_mask = (T * R * _LANES) != HW

    def kernel(x_ref, lbl_ref, stats_ref, acc_ref):
        t = pl.program_id(1)

        @pl.when(t == 0)
        def _init():
            acc_ref[...] = jnp.zeros_like(acc_ref)

        def accumulate(masked):
            lbl = lbl_ref[0, 0].astype(jnp.int32)                  # (R, 128)
            if masked:
                row = jax.lax.broadcasted_iota(jnp.int32, (R, _LANES), 0)
                lane = jax.lax.broadcasted_iota(jnp.int32, (R, _LANES), 1)
                pix = (t * R + row) * _LANES + lane
                valid = pix < HW
                vf = valid.astype(jnp.float32)

            # Per-class logits: full (R,128) vreg tiles, clamped where invalid
            # (kills any NaN garbage from the partial-block DMA before exp).
            xs = []
            for c in range(C):
                xc = x_ref[0, c].astype(jnp.float32)               # (R, 128)
                if masked:
                    xc = jnp.where(valid, xc, 0.0)
                xs.append(xc)

            # Softmax over classes = elementwise ops across the C unrolled
            # slices (VALU/EUP only; no cross-sublane XLU work).
            m = xs[0]
            for c in range(1, C):
                m = jnp.maximum(m, xs[c])
            es = [jnp.exp(xc - m) for xc in xs]
            den = es[0]
            for c in range(1, C):
                den = den + es[c]
            inv = pl.reciprocal(den, approx=False)

            for c in range(C):
                pc = es[c] * inv                                   # prob of class c
                tc = lbl == c                                      # one-hot of class c
                if masked:
                    pc = pc * vf
                    tc = jnp.logical_and(tc, valid)
                # Elementwise (R,128) accumulation — no per-step reductions.
                acc_ref[0, c] += jnp.where(tc, pc, 0.0)            # intersection
                acc_ref[1, c] += pc                                # prob mass
                acc_ref[2, c] += tc.astype(jnp.float32)            # target mass

        if not needs_tail_mask:
            accumulate(False)
        else:
            @pl.when(t < T - 1)
            def _full_tiles():
                accumulate(False)

            @pl.when(t == T - 1)
            def _tail_tile():
                accumulate(True)

        # One sublane reduction per (stat, class) per batch element — the only
        # XLU work in the whole streaming pass.
        @pl.when(t == T - 1)
        def _finalize():
            for s in range(3):
                for c in range(C):
                    stats_ref[0, s, c:c + 1, :] = jnp.sum(
                        acc_ref[s, c], axis=0, keepdims=True)      # (1, 128)

    return kernel


# ---------------------------------------------------------------------------
# Kernel 2: tiny grid-less finalize — dice/IoU, weighted CE, 0.5/0.5 combine.
# ---------------------------------------------------------------------------
def _finalize_kernel(stats_ref, segw_ref, xi_ref, ti_ref, wi_ref, out_ref):
    eps = 1e-5
    st = stats_ref[...].astype(jnp.float32)        # (N, 3, C, 128) partials
    st = jnp.sum(st, axis=0)                       # combine batch/core partials
    st = jnp.sum(st, axis=-1, keepdims=True)       # combine lane partials -> (3, C, 1)
    inter, ps, ts = st[0], st[1], st[2]            # each (C, 1)
    w = segw_ref[...].astype(jnp.float32)          # (C, 1)

    dice_c = (2.0 * inter + eps) / (ps + ts + eps)
    iou_c = (inter + eps) / (ps + ts - inter + eps)
    seg_loss = 1.0 - (jnp.sum(w * dice_c, keepdims=True)
                      / jnp.sum(w, keepdims=True))                 # (1, 1)
    dice = jnp.mean(dice_c, keepdims=True)
    miou = jnp.mean(iou_c, keepdims=True)

    # Weighted softmax cross-entropy on the tiny (N, K) IDH head.
    x2 = xi_ref[...].astype(jnp.float32)           # (N, K)
    t2 = ti_ref[...].astype(jnp.float32)           # (N, K)
    w2 = wi_ref[...].astype(jnp.float32)           # (1, K)
    m2 = jnp.max(x2, axis=1, keepdims=True)
    lse = m2 + jnp.log(jnp.sum(jnp.exp(x2 - m2), axis=1, keepdims=True))
    logp = x2 - lse
    sw = jnp.sum(t2 * w2, axis=1, keepdims=True)   # (N, 1)
    nll = -jnp.sum(t2 * logp, axis=1, keepdims=True)
    idh = (jnp.sum(sw * nll, keepdims=True)
           / jnp.sum(sw, keepdims=True))           # (1, 1)

    loss = 0.5 * seg_loss + 0.5 * idh

    # Pack the 5 scalars into one lane-packed (1, 8) output.
    lane = jax.lax.broadcasted_iota(jnp.int32, (1, 8), 1)
    out = jnp.where(lane == 0, loss, 0.0)
    out = jnp.where(lane == 1, seg_loss, out)
    out = jnp.where(lane == 2, idh, out)
    out = jnp.where(lane == 3, dice, out)
    out = jnp.where(lane == 4, miou, out)
    out_ref[...] = out


# ---------------------------------------------------------------------------
# Wrapper
# ---------------------------------------------------------------------------
@functools.partial(jax.jit, static_argnames=("tile_lanes",))
def awl4_forward(seg_logits, seg_labels, seg_weights,
                 idh_logits, idh_labels, idh_weights, *, tile_lanes=65536):
    """Fused AutomaticWeightedLoss4 forward. Returns 5 f32 scalars."""
    N, C, H, W = seg_logits.shape
    HW = H * W
    K = idh_logits.shape[1]

    Rtot = pl.cdiv(HW, _LANES)                     # 128-pixel rows
    HW_pad = Rtot * _LANES

    # Free reshapes; logits/labels keep their caller dtype (bf16 / narrow int
    # labels halve HBM traffic on v5e) and are cast per tile inside the kernel.
    x = seg_logits.reshape(N, C, HW)
    lbl = seg_labels.reshape(N, 1, HW)
    if HW_pad != HW:
        # One extra tail-pad copy; typical seg shapes (H*W % 128 == 0) skip it.
        pad = HW_pad - HW
        x = jnp.pad(x, ((0, 0), (0, 0), (0, pad)))
        lbl = jnp.pad(lbl, ((0, 0), (0, 0), (0, pad)))
    x = x.reshape(N, C, Rtot, _LANES)              # pixels fill sublanes AND lanes
    lbl = lbl.reshape(N, 1, Rtot, _LANES)

    # Rows per block (multiple of 8 unless it spans the whole row axis).
    R = max(8, (int(tile_lanes) // _LANES) // 8 * 8)
    R = min(R, Rtot)
    T = pl.cdiv(Rtot, R)

    stats = pl.pallas_call(
        _make_stats_kernel(C, R, T, HW),
        out_shape=jax.ShapeDtypeStruct((N, 3, C, _LANES), jnp.float32),
        grid_spec=pltpu.PrefetchScalarGridSpec(
            num_scalar_prefetch=0,
            grid=(N, T),
            in_specs=[
                pl.BlockSpec((1, C, R, _LANES), lambda n, t: (n, 0, t, 0)),
                pl.BlockSpec((1, 1, R, _LANES), lambda n, t: (n, 0, t, 0)),
            ],
            out_specs=pl.BlockSpec((1, 3, C, _LANES), lambda n, t: (n, 0, 0, 0)),
            scratch_shapes=[pltpu.VMEM((3, C, R, _LANES), jnp.float32)],
        ),
        compiler_params=pltpu.CompilerParams(
            # Batch axis parallel (uses both TCs on v7x: each n has its own
            # scratch + its own partial-stats output block); row-tile axis is
            # the sequential reduction.
            dimension_semantics=("parallel", "arbitrary")),
    )(x, lbl)

    wseg = seg_weights.reshape(C, 1).astype(jnp.float32)
    idh_oh = jax.nn.one_hot(idh_labels, K, dtype=jnp.float32)      # tiny (N, K)
    widh = idh_weights.reshape(1, K).astype(jnp.float32)

    packed = pl.pallas_call(
        _finalize_kernel,
        out_shape=jax.ShapeDtypeStruct((1, 8), jnp.float32),
    )(stats, wseg, idh_logits, idh_oh, widh)

    return packed[0, 0], packed[0, 1], packed[0, 2], packed[0, 3], packed[0, 4]


# ---------------------------------------------------------------------------
# AutomaticWeightedLoss4 (forward semantics reproduced exactly)
# ---------------------------------------------------------------------------
class AutomaticWeightedLoss4:
    """equal weighted multi-task loss.

    loss_fn[0] (weighted soft-dice + dice/miou metrics) and loss_fn[1]
    (weighted softmax CE) are implemented in Pallas; the loss_fn argument is
    kept only for API parity with the PyTorch module.
    """

    def __init__(self, task_num, loss_fn=None):
        self.task_num = task_num
        self.loss_fn = loss_fn

    def __call__(self, outputs, targets, weights, *, tile_lanes=65536):
        loss, seg_loss, idh_loss, dice, miou = awl4_forward(
            outputs[0], targets[0], weights[0],
            outputs[1], targets[1], weights[1], tile_lanes=tile_lanes)
        std_1 = 0.5
        std_2 = 0.5
        return (loss, seg_loss, idh_loss, dice, miou, std_1, std_2)


# ---------------------------------------------------------------------------
# Pure-JAX reference (same math) for a correctness check.
# ---------------------------------------------------------------------------
def _ref_forward(outputs, targets, weights):
    logits, labels = outputs[0].astype(jnp.float32), targets[0]
    N, C, H, W = logits.shape
    p = jax.nn.softmax(logits, axis=1)
    t = jnp.transpose(jax.nn.one_hot(labels, C, dtype=jnp.float32), (0, 3, 1, 2))
    eps = 1e-5
    inter = jnp.sum(p * t, axis=(0, 2, 3))
    ps = jnp.sum(p, axis=(0, 2, 3))
    ts = jnp.sum(t, axis=(0, 2, 3))
    dice_c = (2 * inter + eps) / (ps + ts + eps)
    iou_c = (inter + eps) / (ps + ts - inter + eps)
    w = weights[0].astype(jnp.float32)
    seg_loss = 1.0 - jnp.sum(w * dice_c) / jnp.sum(w)
    dice = jnp.mean(dice_c)
    miou = jnp.mean(iou_c)

    x2, y2, w2 = outputs[1].astype(jnp.float32), targets[1], weights[1].astype(jnp.float32)
    logp = jax.nn.log_softmax(x2, axis=1)
    oh = jax.nn.one_hot(y2, x2.shape[1], dtype=jnp.float32)
    sw = jnp.sum(oh * w2[None, :], axis=1)
    nll = -jnp.sum(oh * logp, axis=1)
    idh = jnp.sum(sw * nll) / jnp.sum(sw)
    loss = 0.5 * seg_loss + 0.5 * idh
    return loss, seg_loss, idh, dice, miou


if __name__ == "__main__":
    key = jax.random.PRNGKey(0)
    ks = jax.random.split(key, 4)

    def run_case(H, W, logits_dtype, tile_lanes):
        N, C, K = 2, 4, 2
        seg_logits = jax.random.normal(
            ks[0], (N, C, H, W), dtype=jnp.float32).astype(logits_dtype)
        seg_labels = jax.random.randint(ks[1], (N, H, W), 0, C, dtype=jnp.int32)
        idh_logits = jax.random.normal(ks[2], (N, K), dtype=jnp.float32)
        idh_labels = jax.random.randint(ks[3], (N,), 0, K, dtype=jnp.int32)
        seg_weights = jnp.array([0.1, 0.3, 0.3, 0.3], dtype=jnp.float32)
        idh_weights = jnp.array([0.4, 0.6], dtype=jnp.float32)

        outputs = (seg_logits, idh_logits)
        targets = (seg_labels, idh_labels)
        weights = (seg_weights, idh_weights)

        awl = AutomaticWeightedLoss4(task_num=2)
        res = jax.block_until_ready(
            awl(outputs, targets, weights, tile_lanes=tile_lanes))
        loss, seg_loss, idh_loss, dice, miou, s1, s2 = res
        got = np.array([loss, seg_loss, idh_loss, dice, miou], dtype=np.float32)
        exp = np.array(_ref_forward(outputs, targets, weights), dtype=np.float32)
        np.testing.assert_allclose(got, exp, rtol=1e-4, atol=1e-5)
        assert s1 == 0.5 and s2 == 0.5

    run_case(16, 16, jnp.float32, 65536)    # base: single row-tile per batch element
    run_case(40, 48, jnp.float32, 1024)     # multi row-tile + tail-only masking path
    run_case(16, 20, jnp.float32, 65536)    # H*W not a multiple of 128 (pad path)
    run_case(64, 64, jnp.bfloat16, 65536)   # bf16 logits streamed, f32 math in-kernel

    print("KERNEL_OK")
</pallas_src>

<mosaic_0001>
module attributes {stable_mosaic.version = 11 : i64} {
  func.func @kernel(%arg0: i32, %arg1: i32, %arg2: memref<1x4x2x128xf32, #tpu.memory_space<vmem>>, %arg3: memref<1x1x2x128xi32, #tpu.memory_space<vmem>>, %arg4: memref<1x3x4x128xf32, #tpu.memory_space<vmem>>, %arg5: memref<3x4x2x128xf32, #tpu.memory_space<vmem>>) attributes {dimension_semantics = [#tpu.dimension_semantics<parallel>, #tpu.dimension_semantics<arbitrary>], iteration_bounds = array<i64: 2, 1>, scalar_prefetch = 0 : i64, scratch_operands = 1 : i64, tpu.core_type = #tpu.core_type<tc>, window_params = [{transform_indices = @transform_0, window_bounds = array<i64: 1, 4, 2, 128>}, {transform_indices = @transform_1, window_bounds = array<i64: 1, 1, 2, 128>}, {transform_indices = @transform_2, window_bounds = array<i64: 1, 3, 4, 128>}]} {
    %c0_i32 = arith.constant 0 : i32
    %0 = arith.cmpi eq, %arg1, %c0_i32 : i32
    %1 = arith.extui %0 : i1 to i32
    %c0_i32_0 = arith.constant 0 : i32
    %2 = arith.cmpi ne, %1, %c0_i32_0 : i32
    scf.if %2 {
      %cst_119 = arith.constant 0.000000e+00 : f32
      %131 = vector.broadcast %cst_119 : f32 to vector<3x4x2x128xf32>
      %c0_120 = arith.constant 0 : index
      %c0_121 = arith.constant 0 : index
      %c0_122 = arith.constant 0 : index
      %c0_123 = arith.constant 0 : index
      %132 = vector.load %arg5[%c0_120, %c0_121, %c0_122, %c0_123] : memref<3x4x2x128xf32, #tpu.memory_space<vmem>>, vector<3x4x2x128xf32>
      tpu.vector_store %arg5[%c0_120, %c0_121, %c0_122, %c0_123], %131 {strides = array<i32>} : memref<3x4x2x128xf32, #tpu.memory_space<vmem>>, vector<3x4x2x128xf32>,
    } else {
    }
    %c0 = arith.constant 0 : index
    %c0_1 = arith.constant 0 : index
    %c0_2 = arith.constant 0 : index
    %c0_3 = arith.constant 0 : index
    %3 = vector.load %arg3[%c0, %c0_1, %c0_2, %c0_3] : memref<1x1x2x128xi32, #tpu.memory_space<vmem>>, vector<1x1x2x128xi32>
    %4 = vector.shape_cast %3 : vector<1x1x2x128xi32> to vector<2x128xi32>
    %c0_4 = arith.constant 0 : index
    %c0_5 = arith.constant 0 : index
    %c0_6 = arith.constant 0 : index
    %c0_7 = arith.constant 0 : index
    %5 = vector.load %arg2[%c0_4, %c0_5, %c0_6, %c0_7] : memref<1x4x2x128xf32, #tpu.memory_space<vmem>>, vector<1x1x2x128xf32>
    %6 = vector.shape_cast %5 : vector<1x1x2x128xf32> to vector<2x128xf32>
    %c0_8 = arith.constant 0 : index
    %c1 = arith.constant 1 : index
    %c0_9 = arith.constant 0 : index
    %c0_10 = arith.constant 0 : index
    %7 = vector.load %arg2[%c0_8, %c1, %c0_9, %c0_10] : memref<1x4x2x128xf32, #tpu.memory_space<vmem>>, vector<1x1x2x128xf32>
    %8 = vector.shape_cast %7 : vector<1x1x2x128xf32> to vector<2x128xf32>
    %c0_11 = arith.constant 0 : index
    %c2 = arith.constant 2 : index
    %c0_12 = arith.constant 0 : index
    %c0_13 = arith.constant 0 : index
    %9 = vector.load %arg2[%c0_11, %c2, %c0_12, %c0_13] : memref<1x4x2x128xf32, #tpu.memory_space<vmem>>, vector<1x1x2x128xf32>
    %10 = vector.shape_cast %9 : vector<1x1x2x128xf32> to vector<2x128xf32>
    %c0_14 = arith.constant 0 : index
    %c3 = arith.constant 3 : index
    %c0_15 = arith.constant 0 : index
    %c0_16 = arith.constant 0 : index
    %11 = vector.load %arg2[%c0_14, %c3, %c0_15, %c0_16] : memref<1x4x2x128xf32, #tpu.memory_space<vmem>>, vector<1x1x2x128xf32>
    %12 = vector.shape_cast %11 : vector<1x1x2x128xf32> to vector<2x128xf32>
    %13 = arith.maximumf %6, %8 : vector<2x128xf32>
    %14 = arith.maximumf %13, %10 : vector<2x128xf32>
    %15 = arith.maximumf %14, %12 : vector<2x128xf32>
    %16 = arith.subf %6, %15 : vector<2x128xf32>
    %17 = math.exp %16 : vector<2x128xf32>
    %18 = arith.subf %8, %15 : vector<2x128xf32>
    %19 = math.exp %18 : vector<2x128xf32>
    %20 = arith.subf %10, %15 : vector<2x128xf32>
    %21 = math.exp %20 : vector<2x128xf32>
    %22 = arith.subf %12, %15 : vector<2x128xf32>
    %23 = math.exp %22 : vector<2x128xf32>
    %24 = arith.addf %17, %19 : vector<2x128xf32>
    %25 = arith.addf %24, %21 : vector<2x128xf32>
    %26 = arith.addf %25, %23 : vector<2x128xf32>
    %27 = tpu.reciprocal %26 : vector<2x128xf32> -> vector<2x128xf32>
    %28 = arith.mulf %17, %27 : vector<2x128xf32>
    %c0_i32_17 = arith.constant 0 : i32
    %29 = vector.broadcast %c0_i32_17 : i32 to vector<2x128xi32>
    %30 = arith.cmpi eq, %4, %29 : vector<2x128xi32>
    %c0_18 = arith.constant 0 : index
    %c0_19 = arith.constant 0 : index
    %c0_20 = arith.constant 0 : index
    %c0_21 = arith.constant 0 : index
    %31 = vector.load %arg5[%c0_18, %c0_19, %c0_20, %c0_21] : memref<3x4x2x128xf32, #tpu.memory_space<vmem>>, vector<1x1x2x128xf32>
    %32 = vector.shape_cast %31 : vector<1x1x2x128xf32> to vector<2x128xf32>
    %cst = arith.constant 0.000000e+00 : f32
    %33 = vector.broadcast %cst : f32 to vector<2x128xf32>
    %34 = arith.select %30, %28, %33 : vector<2x128xi1>, vector<2x128xf32>
    %35 = arith.addf %32, %34 : vector<2x128xf32>
    %c0_22 = arith.constant 0 : index
    %c0_23 = arith.constant 0 : index
    %c0_24 = arith.constant 0 : index
    %c0_25 = arith.constant 0 : index
    %36 = vector.load %arg5[%c0_22, %c0_23, %c0_24, %c0_25] : memref<3x4x2x128xf32, #tpu.memory_space<vmem>>, vector<1x1x2x128xf32>
    %37 = vector.shape_cast %36 : vector<1x1x2x128xf32> to vector<2x128xf32>
    %38 = vector.shape_cast %35 : vector<2x128xf32> to vector<1x1x2x128xf32>
    tpu.vector_store %arg5[%c0_22, %c0_23, %c0_24, %c0_25], %38 {strides = array<i32>} : memref<3x4x2x128xf32, #tpu.memory_space<vmem>>, vector<1x1x2x128xf32>,
    %c1_26 = arith.constant 1 : index
    %c0_27 = arith.constant 0 : index
    %c0_28 = arith.constant 0 : index
    %c0_29 = arith.constant 0 : index
    %39 = vector.load %arg5[%c1_26, %c0_27, %c0_28, %c0_29] : memref<3x4x2x128xf32, #tpu.memory_space<vmem>>, vector<1x1x2x128xf32>
    %40 = vector.shape_cast %39 : vector<1x1x2x128xf32> to vector<2x128xf32>
    %41 = arith.addf %40, %28 : vector<2x128xf32>
    %c1_30 = arith.constant 1 : index
    %c0_31 = arith.constant 0 : index
    %c0_32 = arith.constant 0 : index
    %c0_33 = arith.constant 0 : index
    %42 = vector.load %arg5[%c1_30, %c0_31, %c0_32, %c0_33] : memref<3x4x2x128xf32, #tpu.memory_space<vmem>>, vector<1x1x2x128xf32>
    %43 = vector.shape_cast %42 : vector<1x1x2x128xf32> to vector<2x128xf32>
    %44 = vector.shape_cast %41 : vector<2x128xf32> to vector<1x1x2x128xf32>
    tpu.vector_store %arg5[%c1_30, %c0_31, %c0_32, %c0_33], %44 {strides = array<i32>} : memref<3x4x2x128xf32, #tpu.memory_space<vmem>>, vector<1x1x2x128xf32>,
    %c2_34 = arith.constant 2 : index
    %c0_35 = arith.constant 0 : index
    %c0_36 = arith.constant 0 : index
    %c0_37 = arith.constant 0 : index
    %45 = vector.load %arg5[%c2_34, %c0_35, %c0_36, %c0_37] : memref<3x4x2x128xf32, #tpu.memory_space<vmem>>, vector<1x1x2x128xf32>
    %46 = vector.shape_cast %45 : vector<1x1x2x128xf32> to vector<2x128xf32>
    %47 = arith.extui %30 : vector<2x128xi1> to vector<2x128xi32>
    %48 = arith.sitofp %47 : vector<2x128xi32> to vector<2x128xf32>
    %49 = arith.addf %46, %48 : vector<2x128xf32>
    %c2_38 = arith.constant 2 : index
    %c0_39 = arith.constant 0 : index
    %c0_40 = arith.constant 0 : index
    %c0_41 = arith.constant 0 : index
    %50 = vector.load %arg5[%c2_38, %c0_39, %c0_40, %c0_41] : memref<3x4x2x128xf32, #tpu.memory_space<vmem>>, vector<1x1x2x128xf32>
    %51 = vector.shape_cast %50 : vector<1x1x2x128xf32> to vector<2x128xf32>
    %52 = vector.shape_cast %49 : vector<2x128xf32> to vector<1x1x2x128xf32>
    tpu.vector_store %arg5[%c2_38, %c0_39, %c0_40, %c0_41], %52 {strides = array<i32>} : memref<3x4x2x128xf32, #tpu.memory_space<vmem>>, vector<1x1x2x128xf32>,
    %53 = arith.mulf %19, %27 : vector<2x128xf32>
    %c1_i32 = arith.constant 1 : i32
    %54 = vector.broadcast %c1_i32 : i32 to vector<2x128xi32>
    %55 = arith.cmpi eq, %4, %54 : vector<2x128xi32>
    %c0_42 = arith.constant 0 : index
    %c1_43 = arith.constant 1 : index
    %c0_44 = arith.constant 0 : index
    %c0_45 = arith.constant 0 : index
    %56 = vector.load %arg5[%c0_42, %c1_43, %c0_44, %c0_45] : memref<3x4x2x128xf32, #tpu.memory_space<vmem>>, vector<1x1x2x128xf32>
    %57 = vector.shape_cast %56 : vector<1x1x2x128xf32> to vector<2x128xf32>
    %cst_46 = arith.constant 0.000000e+00 : f32
    %58 = vector.broadcast %cst_46 : f32 to vector<2x128xf32>
    %59 = arith.select %55, %53, %58 : vector<2x128xi1>, vector<2x128xf32>
    %60 = arith.addf %57, %59 : vector<2x128xf32>
    %c0_47 = arith.constant 0 : index
    %c1_48 = arith.constant 1 : index
    %c0_49 = arith.constant 0 : index
    %c0_50 = arith.constant 0 : index
    %61 = vector.load %arg5[%c0_47, %c1_48, %c0_49, %c0_50] : memref<3x4x2x128xf32, #tpu.memory_space<vmem>>, vector<1x1x2x128xf32>
    %62 = vector.shape_cast %61 : vector<1x1x2x128xf32> to vector<2x128xf32>
    %63 = vector.shape_cast %60 : vector<2x128xf32> to vector<1x1x2x128xf32>
    tpu.vector_store %arg5[%c0_47, %c1_48, %c0_49, %c0_50], %63 {strides = array<i32>} : memref<3x4x2x128xf32, #tpu.memory_space<vmem>>, vector<1x1x2x128xf32>,
    %c1_51 = arith.constant 1 : index
    %c1_52 = arith.constant 1 : index
    %c0_53 = arith.constant 0 : index
    %c0_54 = arith.constant 0 : index
    %64 = vector.load %arg5[%c1_51, %c1_52, %c0_53, %c0_54] : memref<3x4x2x128xf32, #tpu.memory_space<vmem>>, vector<1x1x2x128xf32>
    %65 = vector.shape_cast %64 : vector<1x1x2x128xf32> to vector<2x128xf32>
    %66 = arith.addf %65, %53 : vector<2x128xf32>
    %c1_55 = arith.constant 1 : index
    %c1_56 = arith.constant 1 : index
    %c0_57 = arith.constant 0 : index
    %c0_58 = arith.constant 0 : index
    %67 = vector.load %arg5[%c1_55, %c1_56, %c0_57, %c0_58] : memref<3x4x2x128xf32, #tpu.memory_space<vmem>>, vector<1x1x2x128xf32>
    %68 = vector.shape_cast %67 : vector<1x1x2x128xf32> to vector<2x128xf32>
    %69 = vector.shape_cast %66 : vector<2x128xf32> to vector<1x1x2x128xf32>
    tpu.vector_store %arg5[%c1_55, %c1_56, %c0_57, %c0_58], %69 {strides = array<i32>} : memref<3x4x2x128xf32, #tpu.memory_space<vmem>>, vector<1x1x2x128xf32>,
    %c2_59 = arith.constant 2 : index
    %c1_60 = arith.constant 1 : index
    %c0_61 = arith.constant 0 : index
    %c0_62 = arith.constant 0 : index
    %70 = vector.load %arg5[%c2_59, %c1_60, %c0_61, %c0_62] : memref<3x4x2x128xf32, #tpu.memory_space<vmem>>, vector<1x1x2x128xf32>
    %71 = vector.shape_cast %70 : vector<1x1x2x128xf32> to vector<2x128xf32>
    %72 = arith.extui %55 : vector<2x128xi1> to vector<2x128xi32>
    %73 = arith.sitofp %72 : vector<2x128xi32> to vector<2x128xf32>
    %74 = arith.addf %71, %73 : vector<2x128xf32>
    %c2_63 = arith.constant 2 : index
    %c1_64 = arith.constant 1 : index
    %c0_65 = arith.constant 0 : index
    %c0_66 = arith.constant 0 : index
    %75 = vector.load %arg5[%c2_63, %c1_64, %c0_65, %c0_66] : memref<3x4x2x128xf32, #tpu.memory_space<vmem>>, vector<1x1x2x128xf32>
    %76 = vector.shape_cast %75 : vector<1x1x2x128xf32> to vector<2x128xf32>
    %77 = vector.shape_cast %74 : vector<2x128xf32> to vector<1x1x2x128xf32>
    tpu.vector_store %arg5[%c2_63, %c1_64, %c0_65, %c0_66], %77 {strides = array<i32>} : memref<3x4x2x128xf32, #tpu.memory_space<vmem>>, vector<1x1x2x128xf32>,
    %78 = arith.mulf %21, %27 : vector<2x128xf32>
    %c2_i32 = arith.constant 2 : i32
    %79 = vector.broadcast %c2_i32 : i32 to vector<2x128xi32>
    %80 = arith.cmpi eq, %4, %79 : vector<2x128xi32>
    %c0_67 = arith.constant 0 : index
    %c2_68 = arith.constant 2 : index
    %c0_69 = arith.constant 0 : index
    %c0_70 = arith.constant 0 : index
    %81 = vector.load %arg5[%c0_67, %c2_68, %c0_69, %c0_70] : memref<3x4x2x128xf32, #tpu.memory_space<vmem>>, vector<1x1x2x128xf32>
    %82 = vector.shape_cast %81 : vector<1x1x2x128xf32> to vector<2x128xf32>
    %cst_71 = arith.constant 0.000000e+00 : f32
    %83 = vector.broadcast %cst_71 : f32 to vector<2x128xf32>
    %84 = arith.select %80, %78, %83 : vector<2x128xi1>, vector<2x128xf32>
    %85 = arith.addf %82, %84 : vector<2x128xf32>
    %c0_72 = arith.constant 0 : index
    %c2_73 = arith.constant 2 : index
    %c0_74 = arith.constant 0 : index
    %c0_75 = arith.constant 0 : index
    %86 = vector.load %arg5[%c0_72, %c2_73, %c0_74, %c0_75] : memref<3x4x2x128xf32, #tpu.memory_space<vmem>>, vector<1x1x2x128xf32>
    %87 = vector.shape_cast %86 : vector<1x1x2x128xf32> to vector<2x128xf32>
    %88 = vector.shape_cast %85 : vector<2x128xf32> to vector<1x1x2x128xf32>
    tpu.vector_store %arg5[%c0_72, %c2_73, %c0_74, %c0_75], %88 {strides = array<i32>} : memref<3x4x2x128xf32, #tpu.memory_space<vmem>>, vector<1x1x2x128xf32>,
    %c1_76 = arith.constant 1 : index
    %c2_77 = arith.constant 2 : index
    %c0_78 = arith.constant 0 : index
    %c0_79 = arith.constant 0 : index
    %89 = vector.load %arg5[%c1_76, %c2_77, %c0_78, %c0_79] : memref<3x4x2x128xf32, #tpu.memory_space<vmem>>, vector<1x1x2x128xf32>
    %90 = vector.shape_cast %89 : vector<1x1x2x128xf32> to vector<2x128xf32>
    %91 = arith.addf %90, %78 : vector<2x128xf32>
    %c1_80 = arith.constant 1 : index
    %c2_81 = arith.constant 2 : index
    %c0_82 = arith.constant 0 : index
    %c0_83 = arith.constant 0 : index
    %92 = vector.load %arg5[%c1_80, %c2_81, %c0_82, %c0_83] : memref<3x4x2x128xf32, #tpu.memory_space<vmem>>, vector<1x1x2x128xf32>
    %93 = vector.shape_cast %92 : vector<1x1x2x128xf32> to vector<2x128xf32>
    %94 = vector.shape_cast %91 : vector<2x128xf32> to vector<1x1x2x128xf32>
    tpu.vector_store %arg5[%c1_80, %c2_81, %c0_82, %c0_83], %94 {strides = array<i32>} : memref<3x4x2x128xf32, #tpu.memory_space<vmem>>, vector<1x1x2x128xf32>,
    %c2_84 = arith.constant 2 : index
    %c2_85 = arith.constant 2 : index
    %c0_86 = arith.constant 0 : index
    %c0_87 = arith.constant 0 : index
    %95 = vector.load %arg5[%c2_84, %c2_85, %c0_86, %c0_87] : memref<3x4x2x128xf32, #tpu.memory_space<vmem>>, vector<1x1x2x128xf32>
    %96 = vector.shape_cast %95 : vector<1x1x2x128xf32> to vector<2x128xf32>
    %97 = arith.extui %80 : vector<2x128xi1> to vector<2x128xi32>
    %98 = arith.sitofp %97 : vector<2x128xi32> to vector<2x128xf32>
    %99 = arith.addf %96, %98 : vector<2x128xf32>
    %c2_88 = arith.constant 2 : index
    %c2_89 = arith.constant 2 : index
    %c0_90 = arith.constant 0 : index
    %c0_91 = arith.constant 0 : index
    %100 = vector.load %arg5[%c2_88, %c2_89, %c0_90, %c0_91] : memref<3x4x2x128xf32, #tpu.memory_space<vmem>>, vector<1x1x2x128xf32>
    %101 = vector.shape_cast %100 : vector<1x1x2x128xf32> to vector<2x128xf32>
    %102 = vector.shape_cast %99 : vector<2x128xf32> to vector<1x1x2x128xf32>
    tpu.vector_store %arg5[%c2_88, %c2_89, %c0_90, %c0_91], %102 {strides = array<i32>} : memref<3x4x2x128xf32, #tpu.memory_space<vmem>>, vector<1x1x2x128xf32>,
    %103 = arith.mulf %23, %27 : vector<2x128xf32>
    %c3_i32 = arith.constant 3 : i32
    %104 = vector.broadcast %c3_i32 : i32 to vector<2x128xi32>
    %105 = arith.cmpi eq, %4, %104 : vector<2x128xi32>
    %c0_92 = arith.constant 0 : index
    %c3_93 = arith.constant 3 : index
    %c0_94 = arith.constant 0 : index
    %c0_95 = arith.constant 0 : index
    %106 = vector.load %arg5[%c0_92, %c3_93, %c0_94, %c0_95] : memref<3x4x2x128xf32, #tpu.memory_space<vmem>>, vector<1x1x2x128xf32>
    %107 = vector.shape_cast %106 : vector<1x1x2x128xf32> to vector<2x128xf32>
    %cst_96 = arith.constant 0.000000e+00 : f32
    %108 = vector.broadcast %cst_96 : f32 to vector<2x128xf32>
    %109 = arith.select %105, %103, %108 : vector<2x128xi1>, vector<2x128xf32>
    %110 = arith.addf %107, %109 : vector<2x128xf32>
    %c0_97 = arith.constant 0 : index
    %c3_98 = arith.constant 3 : index
    %c0_99 = arith.constant 0 : index
    %c0_100 = arith.constant 0 : index
    %111 = vector.load %arg5[%c0_97, %c3_98, %c0_99, %c0_100] : memref<3x4x2x128xf32, #tpu.memory_space<vmem>>, vector<1x1x2x128xf32>
    %112 = vector.shape_cast %111 : vector<1x1x2x128xf32> to vector<2x128xf32>
    %113 = vector.shape_cast %110 : vector<2x128xf32> to vector<1x1x2x128xf32>
    tpu.vector_store %arg5[%c0_97, %c3_98, %c0_99, %c0_100], %113 {strides = array<i32>} : memref<3x4x2x128xf32, #tpu.memory_space<vmem>>, vector<1x1x2x128xf32>,
    %c1_101 = arith.constant 1 : index
    %c3_102 = arith.constant 3 : index
    %c0_103 = arith.constant 0 : index
    %c0_104 = arith.constant 0 : index
    %114 = vector.load %arg5[%c1_101, %c3_102, %c0_103, %c0_104] : memref<3x4x2x128xf32, #tpu.memory_space<vmem>>, vector<1x1x2x128xf32>
    %115 = vector.shape_cast %114 : vector<1x1x2x128xf32> to vector<2x128xf32>
    %116 = arith.addf %115, %103 : vector<2x128xf32>
    %c1_105 = arith.constant 1 : index
    %c3_106 = arith.constant 3 : index
    %c0_107 = arith.constant 0 : index
    %c0_108 = arith.constant 0 : index
    %117 = vector.load %arg5[%c1_105, %c3_106, %c0_107, %c0_108] : memref<3x4x2x128xf32, #tpu.memory_space<vmem>>, vector<1x1x2x128xf32>
    %118 = vector.shape_cast %117 : vector<1x1x2x128xf32> to vector<2x128xf32>
    %119 = vector.shape_cast %116 : vector<2x128xf32> to vector<1x1x2x128xf32>
    tpu.vector_store %arg5[%c1_105, %c3_106, %c0_107, %c0_108], %119 {strides = array<i32>} : memref<3x4x2x128xf32, #tpu.memory_space<vmem>>, vector<1x1x2x128xf32>,
    %c2_109 = arith.constant 2 : index
    %c3_110 = arith.constant 3 : index
    %c0_111 = arith.constant 0 : index
    %c0_112 = arith.constant 0 : index
    %120 = vector.load %arg5[%c2_109, %c3_110, %c0_111, %c0_112] : memref<3x4x2x128xf32, #tpu.memory_space<vmem>>, vector<1x1x2x128xf32>
    %121 = vector.shape_cast %120 : vector<1x1x2x128xf32> to vector<2x128xf32>
    %122 = arith.extui %105 : vector<2x128xi1> to vector<2x128xi32>
    %123 = arith.sitofp %122 : vector<2x128xi32> to vector<2x128xf32>
    %124 = arith.addf %121, %123 : vector<2x128xf32>
    %c2_113 = arith.constant 2 : index
    %c3_114 = arith.constant 3 : index
    %c0_115 = arith.constant 0 : index
    %c0_116 = arith.constant 0 : index
    %125 = vector.load %arg5[%c2_113, %c3_114, %c0_115, %c0_116] : memref<3x4x2x128xf32, #tpu.memory_space<vmem>>, vector<1x1x2x128xf32>
    %126 = vector.shape_cast %125 : vector<1x1x2x128xf32> to vector<2x128xf32>
    %127 = vector.shape_cast %124 : vector<2x128xf32> to vector<1x1x2x128xf32>
    tpu.vector_store %arg5[%c2_113, %c3_114, %c0_115, %c0_116], %127 {strides = array<i32>} : memref<3x4x2x128xf32, #tpu.memory_space<vmem>>, vector<1x1x2x128xf32>,
    %c0_i32_117 = arith.constant 0 : i32
    %128 = arith.cmpi eq, %arg1, %c0_i32_117 : i32
    %129 = arith.extui %128 : i1 to i32
    %c0_i32_118 = arith.constant 0 : i32
    %130 = arith.cmpi ne, %129, %c0_i32_118 : i32
    scf.if %130 {
      %c0_119 = arith.constant 0 : index
      %c0_120 = arith.constant 0 : index
      %c0_121 = arith.constant 0 : index
      %c0_122 = arith.constant 0 : index
      %131 = vector.load %arg5[%c0_119, %c0_120, %c0_121, %c0_122] : memref<3x4x2x128xf32, #tpu.memory_space<vmem>>, vector<1x1x2x128xf32>
      %132 = vector.shape_cast %131 : vector<1x1x2x128xf32> to vector<2x128xf32>
      %cst_123 = arith.constant dense<0.000000e+00> : vector<128xf32>
      %133 = vector.multi_reduction <add>, %132, %cst_123 [0] : vector<2x128xf32> to vector<128xf32>
      %134 = vector.shape_cast %133 : vector<128xf32> to vector<1x128xf32>
      %c0_124 = arith.constant 0 : index
      %c0_125 = arith.constant 0 : index
      %c0_126 = arith.constant 0 : index
      %c0_127 = arith.constant 0 : index
      %135 = vector.load %arg4[%c0_124, %c0_125, %c0_126, %c0_127] : memref<1x3x4x128xf32, #tpu.memory_space<vmem>>, vector<1x1x1x128xf32>
      %136 = vector.shape_cast %135 : vector<1x1x1x128xf32> to vector<1x128xf32>
      %137 = vector.shape_cast %134 : vector<1x128xf32> to vector<1x1x1x128xf32>
      tpu.vector_store %arg4[%c0_124, %c0_125, %c0_126, %c0_127], %137 {strides = array<i32>} : memref<1x3x4x128xf32, #tpu.memory_space<vmem>>, vector<1x1x1x128xf32>,
      %c0_128 = arith.constant 0 : index
      %c1_129 = arith.constant 1 : index
      %c0_130 = arith.constant 0 : index
      %c0_131 = arith.constant 0 : index
      %138 = vector.load %arg5[%c0_128, %c1_129, %c0_130, %c0_131] : memref<3x4x2x128xf32, #tpu.memory_space<vmem>>, vector<1x1x2x128xf32>
      %139 = vector.shape_cast %138 : vector<1x1x2x128xf32> to vector<2x128xf32>
      %cst_132 = arith.constant dense<0.000000e+00> : vector<128xf32>
      %140 = vector.multi_reduction <add>, %139, %cst_132 [0] : vector<2x128xf32> to vector<128xf32>
      %141 = vector.shape_cast %140 : vector<128xf32> to vector<1x128xf32>
      %c0_133 = arith.constant 0 : index
      %c0_134 = arith.constant 0 : index
      %c1_135 = arith.constant 1 : index
      %c0_136 = arith.constant 0 : index
      %142 = vector.load %arg4[%c0_133, %c0_134, %c1_135, %c0_136] : memref<1x3x4x128xf32, #tpu.memory_space<vmem>>, vector<1x1x1x128xf32>
      %143 = vector.shape_cast %142 : vector<1x1x1x128xf32> to vector<1x128xf32>
      %144 = vector.shape_cast %141 : vector<1x128xf32> to vector<1x1x1x128xf32>
      tpu.vector_store %arg4[%c0_133, %c0_134, %c1_135, %c0_136], %144 {strides = array<i32>} : memref<1x3x4x128xf32, #tpu.memory_space<vmem>>, vector<1x1x1x128xf32>,
      %c0_137 = arith.constant 0 : index
      %c2_138 = arith.constant 2 : index
      %c0_139 = arith.constant 0 : index
      %c0_140 = arith.constant 0 : index
      %145 = vector.load %arg5[%c0_137, %c2_138, %c0_139, %c0_140] : memref<3x4x2x128xf32, #tpu.memory_space<vmem>>, vector<1x1x2x128xf32>
      %146 = vector.shape_cast %145 : vector<1x1x2x128xf32> to vector<2x128xf32>
      %cst_141 = arith.constant dense<0.000000e+00> : vector<128xf32>
      %147 = vector.multi_reduction <add>, %146, %cst_141 [0] : vector<2x128xf32> to vector<128xf32>
      %148 = vector.shape_cast %147 : vector<128xf32> to vector<1x128xf32>
      %c0_142 = arith.constant 0 : index
      %c0_143 = arith.constant 0 : index
      %c2_144 = arith.constant 2 : index
      %c0_145 = arith.constant 0 : index
      %149 = vector.load %arg4[%c0_142, %c0_143, %c2_144, %c0_145] : memref<1x3x4x128xf32, #tpu.memory_space<vmem>>, vector<1x1x1x128xf32>
      %150 = vector.shape_cast %149 : vector<1x1x1x128xf32> to vector<1x128xf32>
      %151 = vector.shape_cast %148 : vector<1x128xf32> to vector<1x1x1x128xf32>
      tpu.vector_store %arg4[%c0_142, %c0_143, %c2_144, %c0_145], %151 {strides = array<i32>} : memref<1x3x4x128xf32, #tpu.memory_space<vmem>>, vector<1x1x1x128xf32>,
      %c0_146 = arith.constant 0 : index
      %c3_147 = arith.constant 3 : index
      %c0_148 = arith.constant 0 : index
      %c0_149 = arith.constant 0 : index
      %152 = vector.load %arg5[%c0_146, %c3_147, %c0_148, %c0_149] : memref<3x4x2x128xf32, #tpu.memory_space<vmem>>, vector<1x1x2x128xf32>
      %153 = vector.shape_cast %152 : vector<1x1x2x128xf32> to vector<2x128xf32>
      %cst_150 = arith.constant dense<0.000000e+00> : vector<128xf32>
      %154 = vector.multi_reduction <add>, %153, %cst_150 [0] : vector<2x128xf32> to vector<128xf32>
      %155 = vector.shape_cast %154 : vector<128xf32> to vector<1x128xf32>
      %c0_151 = arith.constant 0 : index
      %c0_152 = arith.constant 0 : index
      %c3_153 = arith.constant 3 : index
      %c0_154 = arith.constant 0 : index
      %156 = vector.load %arg4[%c0_151, %c0_152, %c3_153, %c0_154] : memref<1x3x4x128xf32, #tpu.memory_space<vmem>>, vector<1x1x1x128xf32>
      %157 = vector.shape_cast %156 : vector<1x1x1x128xf32> to vector<1x128xf32>
      %158 = vector.shape_cast %155 : vector<1x128xf32> to vector<1x1x1x128xf32>
      tpu.vector_store %arg4[%c0_151, %c0_152, %c3_153, %c0_154], %158 {strides = array<i32>} : memref<1x3x4x128xf32, #tpu.memory_space<vmem>>, vector<1x1x1x128xf32>,
      %c1_155 = arith.constant 1 : index
      %c0_156 = arith.constant 0 : index
      %c0_157 = arith.constant 0 : index
      %c0_158 = arith.constant 0 : index
      %159 = vector.load %arg5[%c1_155, %c0_156, %c0_157, %c0_158] : memref<3x4x2x128xf32, #tpu.memory_space<vmem>>, vector<1x1x2x128xf32>
      %160 = vector.shape_cast %159 : vector<1x1x2x128xf32> to vector<2x128xf32>
      %cst_159 = arith.constant dense<0.000000e+00> : vector<128xf32>
      %161 = vector.multi_reduction <add>, %160, %cst_159 [0] : vector<2x128xf32> to vector<128xf32>
      %162 = vector.shape_cast %161 : vector<128xf32> to vector<1x128xf32>
      %c0_160 = arith.constant 0 : index
      %c1_161 = arith.constant 1 : index
      %c0_162 = arith.constant 0 : index
      %c0_163 = arith.constant 0 : index
      %163 = vector.load %arg4[%c0_160, %c1_161, %c0_162, %c0_163] : memref<1x3x4x128xf32, #tpu.memory_space<vmem>>, vector<1x1x1x128xf32>
      %164 = vector.shape_cast %163 : vector<1x1x1x128xf32> to vector<1x128xf32>
      %165 = vector.shape_cast %162 : vector<1x128xf32> to vector<1x1x1x128xf32>
      tpu.vector_store %arg4[%c0_160, %c1_161, %c0_162, %c0_163], %165 {strides = array<i32>} : memref<1x3x4x128xf32, #tpu.memory_space<vmem>>, vector<1x1x1x128xf32>,
      %c1_164 = arith.constant 1 : index
      %c1_165 = arith.constant 1 : index
      %c0_166 = arith.constant 0 : index
      %c0_167 = arith.constant 0 : index
      %166 = vector.load %arg5[%c1_164, %c1_165, %c0_166, %c0_167] : memref<3x4x2x128xf32, #tpu.memory_space<vmem>>, vector<1x1x2x128xf32>
      %167 = vector.shape_cast %166 : vector<1x1x2x128xf32> to vector<2x128xf32>
      %cst_168 = arith.constant dense<0.000000e+00> : vector<128xf32>
      %168 = vector.multi_reduction <add>, %167, %cst_168 [0] : vector<2x128xf32> to vector<128xf32>
      %169 = vector.shape_cast %168 : vector<128xf32> to vector<1x128xf32>
      %c0_169 = arith.constant 0 : index
      %c1_170 = arith.constant 1 : index
      %c1_171 = arith.constant 1 : index
      %c0_172 = arith.constant 0 : index
      %170 = vector.load %arg4[%c0_169, %c1_170, %c1_171, %c0_172] : memref<1x3x4x128xf32, #tpu.memory_space<vmem>>, vector<1x1x1x128xf32>
      %171 = vector.shape_cast %170 : vector<1x1x1x128xf32> to vector<1x128xf32>
      %172 = vector.shape_cast %169 : vector<1x128xf32> to vector<1x1x1x128xf32>
      tpu.vector_store %arg4[%c0_169, %c1_170, %c1_171, %c0_172], %172 {strides = array<i32>} : memref<1x3x4x128xf32, #tpu.memory_space<vmem>>, vector<1x1x1x128xf32>,
      %c1_173 = arith.constant 1 : index
      %c2_174 = arith.constant 2 : index
      %c0_175 = arith.constant 0 : index
      %c0_176 = arith.constant 0 : index
      %173 = vector.load %arg5[%c1_173, %c2_174, %c0_175, %c0_176] : memref<3x4x2x128xf32, #tpu.memory_space<vmem>>, vector<1x1x2x128xf32>
      %174 = vector.shape_cast %173 : vector<1x1x2x128xf32> to vector<2x128xf32>
      %cst_177 = arith.constant dense<0.000000e+00> : vector<128xf32>
      %175 = vector.multi_reduction <add>, %174, %cst_177 [0] : vector<2x128xf32> to vector<128xf32>
      %176 = vector.shape_cast %175 : vector<128xf32> to vector<1x128xf32>
      %c0_178 = arith.constant 0 : index
      %c1_179 = arith.constant 1 : index
      %c2_180 = arith.constant 2 : index
      %c0_181 = arith.constant 0 : index
      %177 = vector.load %arg4[%c0_178, %c1_179, %c2_180, %c0_181] : memref<1x3x4x128xf32, #tpu.memory_space<vmem>>, vector<1x1x1x128xf32>
      %178 = vector.shape_cast %177 : vector<1x1x1x128xf32> to vector<1x128xf32>
      %179 = vector.shape_cast %176 : vector<1x128xf32> to vector<1x1x1x128xf32>
      tpu.vector_store %arg4[%c0_178, %c1_179, %c2_180, %c0_181], %179 {strides = array<i32>} : memref<1x3x4x128xf32, #tpu.memory_space<vmem>>, vector<1x1x1x128xf32>,
      %c1_182 = arith.constant 1 : index
      %c3_183 = arith.constant 3 : index
      %c0_184 = arith.constant 0 : index
      %c0_185 = arith.constant 0 : index
      %180 = vector.load %arg5[%c1_182, %c3_183, %c0_184, %c0_185] : memref<3x4x2x128xf32, #tpu.memory_space<vmem>>, vector<1x1x2x128xf32>
      %181 = vector.shape_cast %180 : vector<1x1x2x128xf32> to vector<2x128xf32>
      %cst_186 = arith.constant dense<0.000000e+00> : vector<128xf32>
      %182 = vector.multi_reduction <add>, %181, %cst_186 [0] : vector<2x128xf32> to vector<128xf32>
      %183 = vector.shape_cast %182 : vector<128xf32> to vector<1x128xf32>
      %c0_187 = arith.constant 0 : index
      %c1_188 = arith.constant 1 : index
      %c3_189 = arith.constant 3 : index
      %c0_190 = arith.constant 0 : index
      %184 = vector.load %arg4[%c0_187, %c1_188, %c3_189, %c0_190] : memref<1x3x4x128xf32, #tpu.memory_space<vmem>>, vector<1x1x1x128xf32>
      %185 = vector.shape_cast %184 : vector<1x1x1x128xf32> to vector<1x128xf32>
      %186 = vector.shape_cast %183 : vector<1x128xf32> to vector<1x1x1x128xf32>
      tpu.vector_store %arg4[%c0_187, %c1_188, %c3_189, %c0_190], %186 {strides = array<i32>} : memref<1x3x4x128xf32, #tpu.memory_space<vmem>>, vector<1x1x1x128xf32>,
      %c2_191 = arith.constant 2 : index
      %c0_192 = arith.constant 0 : index
      %c0_193 = arith.constant 0 : index
      %c0_194 = arith.constant 0 : index
      %187 = vector.load %arg5[%c2_191, %c0_192, %c0_193, %c0_194] : memref<3x4x2x128xf32, #tpu.memory_space<vmem>>, vector<1x1x2x128xf32>
      %188 = vector.shape_cast %187 : vector<1x1x2x128xf32> to vector<2x128xf32>
      %cst_195 = arith.constant dense<0.000000e+00> : vector<128xf32>
      %189 = vector.multi_reduction <add>, %188, %cst_195 [0] : vector<2x128xf32> to vector<128xf32>
      %190 = vector.shape_cast %189 : vector<128xf32> to vector<1x128xf32>
      %c0_196 = arith.constant 0 : index
      %c2_197 = arith.constant 2 : index
      %c0_198 = arith.constant 0 : index
      %c0_199 = arith.constant 0 : index
      %191 = vector.load %arg4[%c0_196, %c2_197, %c0_198, %c0_199] : memref<1x3x4x128xf32, #tpu.memory_space<vmem>>, vector<1x1x1x128xf32>
      %192 = vector.shape_cast %191 : vector<1x1x1x128xf32> to vector<1x128xf32>
      %193 = vector.shape_cast %190 : vector<1x128xf32> to vector<1x1x1x128xf32>
      tpu.vector_store %arg4[%c0_196, %c2_197, %c0_198, %c0_199], %193 {strides = array<i32>} : memref<1x3x4x128xf32, #tpu.memory_space<vmem>>, vector<1x1x1x128xf32>,
      %c2_200 = arith.constant 2 : index
      %c1_201 = arith.constant 1 : index
      %c0_202 = arith.constant 0 : index
      %c0_203 = arith.constant 0 : index
      %194 = vector.load %arg5[%c2_200, %c1_201, %c0_202, %c0_203] : memref<3x4x2x128xf32, #tpu.memory_space<vmem>>, vector<1x1x2x128xf32>
      %195 = vector.shape_cast %194 : vector<1x1x2x128xf32> to vector<2x128xf32>
      %cst_204 = arith.constant dense<0.000000e+00> : vector<128xf32>
      %196 = vector.multi_reduction <add>, %195, %cst_204 [0] : vector<2x128xf32> to vector<128xf32>
      %197 = vector.shape_cast %196 : vector<128xf32> to vector<1x128xf32>
      %c0_205 = arith.constant 0 : index
      %c2_206 = arith.constant 2 : index
      %c1_207 = arith.constant 1 : index
      %c0_208 = arith.constant 0 : index
      %198 = vector.load %arg4[%c0_205, %c2_206, %c1_207, %c0_208] : memref<1x3x4x128xf32, #tpu.memory_space<vmem>>, vector<1x1x1x128xf32>
      %199 = vector.shape_cast %198 : vector<1x1x1x128xf32> to vector<1x128xf32>
      %200 = vector.shape_cast %197 : vector<1x128xf32> to vector<1x1x1x128xf32>
      tpu.vector_store %arg4[%c0_205, %c2_206, %c1_207, %c0_208], %200 {strides = array<i32>} : memref<1x3x4x128xf32, #tpu.memory_space<vmem>>, vector<1x1x1x128xf32>,
      %c2_209 = arith.constant 2 : index
      %c2_210 = arith.constant 2 : index
      %c0_211 = arith.constant 0 : index
      %c0_212 = arith.constant 0 : index
      %201 = vector.load %arg5[%c2_209, %c2_210, %c0_211, %c0_212] : memref<3x4x2x128xf32, #tpu.memory_space<vmem>>, vector<1x1x2x128xf32>
      %202 = vector.shape_cast %201 : vector<1x1x2x128xf32> to vector<2x128xf32>
      %cst_213 = arith.constant dense<0.000000e+00> : vector<128xf32>
      %203 = vector.multi_reduction <add>, %202, %cst_213 [0] : vector<2x128xf32> to vector<128xf32>
      %204 = vector.shape_cast %203 : vector<128xf32> to vector<1x128xf32>
      %c0_214 = arith.constant 0 : index
      %c2_215 = arith.constant 2 : index
      %c2_216 = arith.constant 2 : index
      %c0_217 = arith.constant 0 : index
      %205 = vector.load %arg4[%c0_214, %c2_215, %c2_216, %c0_217] : memref<1x3x4x128xf32, #tpu.memory_space<vmem>>, vector<1x1x1x128xf32>
      %206 = vector.shape_cast %205 : vector<1x1x1x128xf32> to vector<1x128xf32>
      %207 = vector.shape_cast %204 : vector<1x128xf32> to vector<1x1x1x128xf32>
      tpu.vector_store %arg4[%c0_214, %c2_215, %c2_216, %c0_217], %207 {strides = array<i32>} : memref<1x3x4x128xf32, #tpu.memory_space<vmem>>, vector<1x1x1x128xf32>,
      %c2_218 = arith.constant 2 : index
      %c3_219 = arith.constant 3 : index
      %c0_220 = arith.constant 0 : index
      %c0_221 = arith.constant 0 : index
      %208 = vector.load %arg5[%c2_218, %c3_219, %c0_220, %c0_221] : memref<3x4x2x128xf32, #tpu.memory_space<vmem>>, vector<1x1x2x128xf32>
      %209 = vector.shape_cast %208 : vector<1x1x2x128xf32> to vector<2x128xf32>
      %cst_222 = arith.constant dense<0.000000e+00> : vector<128xf32>
      %210 = vector.multi_reduction <add>, %209, %cst_222 [0] : vector<2x128xf32> to vector<128xf32>
      %211 = vector.shape_cast %210 : vector<128xf32> to vector<1x128xf32>
      %c0_223 = arith.constant 0 : index
      %c2_224 = arith.constant 2 : index
      %c3_225 = arith.constant 3 : index
      %c0_226 = arith.constant 0 : index
      %212 = vector.load %arg4[%c0_223, %c2_224, %c3_225, %c0_226] : memref<1x3x4x128xf32, #tpu.memory_space<vmem>>, vector<1x1x1x128xf32>
      %213 = vector.shape_cast %212 : vector<1x1x1x128xf32> to vector<1x128xf32>
      %214 = vector.shape_cast %211 : vector<1x128xf32> to vector<1x1x1x128xf32>
      tpu.vector_store %arg4[%c0_223, %c2_224, %c3_225, %c0_226], %214 {strides = array<i32>} : memref<1x3x4x128xf32, #tpu.memory_space<vmem>>, vector<1x1x1x128xf32>,
    } else {
    }
    return
  }
  func.func @transform_0(%arg0: i32, %arg1: i32) -> (i32, i32, i32, i32) {
    %c0_i32 = arith.constant 0 : i32
    %c0_i32_0 = arith.constant 0 : i32
    %c0_i32_1 = arith.constant 0 : i32
    return %arg0, %c0_i32, %arg1, %c0_i32_0 : i32, i32, i32, i32
  }
  func.func @transform_1(%arg0: i32, %arg1: i32) -> (i32, i32, i32, i32) {
    %c0_i32 = arith.constant 0 : i32
    %c0_i32_0 = arith.constant 0 : i32
    %c0_i32_1 = arith.constant 0 : i32
    return %arg0, %c0_i32, %arg1, %c0_i32_0 : i32, i32, i32, i32
  }
  func.func @transform_2(%arg0: i32, %arg1: i32) -> (i32, i32, i32, i32) {
    %c0_i32 = arith.constant 0 : i32
    %c0_i32_0 = arith.constant 0 : i32
    %c0_i32_1 = arith.constant 0 : i32
    %c0_i32_2 = arith.constant 0 : i32
    return %arg0, %c0_i32, %c0_i32_0, %c0_i32_1 : i32, i32, i32, i32
  }
}

module attributes {stable_mosaic.version = 11 : i64} {
  func.func @_finalize_kernel(%arg0: memref<2x3x4x128xf32, #tpu.memory_space<vmem>>, %arg1: memref<4x1xf32, #tpu.memory_space<vmem>>, %arg2: memref<2x2xf32, #tpu.memory_space<vmem>>, %arg3: memref<2x2xf32, #tpu.memory_space<vmem>>, %arg4: memref<1x2xf32, #tpu.memory_space<vmem>>, %arg5: memref<1x8xf32, #tpu.memory_space<vmem>>) attributes {dimension_semantics = [], scalar_prefetch = 0 : i64, scratch_operands = 0 : i64, tpu.core_type = #tpu.core_type<tc>} {
    %c0 = arith.constant 0 : index
    %c0_0 = arith.constant 0 : index
    %c0_1 = arith.constant 0 : index
    %c0_2 = arith.constant 0 : index
    %0 = vector.load %arg0[%c0, %c0_0, %c0_1, %c0_2] : memref<2x3x4x128xf32, #tpu.memory_space<vmem>>, vector<2x3x4x128xf32>
    %cst = arith.constant dense<0.000000e+00> : vector<3x4x128xf32>
    %1 = vector.multi_reduction <add>, %0, %cst [0] : vector<2x3x4x128xf32> to vector<3x4x128xf32>
    %cst_3 = arith.constant dense<0.000000e+00> : vector<3x4xf32>
    %2 = vector.multi_reduction <add>, %1, %cst_3 [2] : vector<3x4x128xf32> to vector<3x4xf32>
    %3 = vector.shape_cast %2 : vector<3x4xf32> to vector<3x4x1xf32>
    %4 = vector.extract_strided_slice %3 {offsets = [0, 0, 0], sizes = [1, 4, 1], strides = [1, 1, 1]} : vector<3x4x1xf32> to vector<1x4x1xf32>
    %5 = vector.shape_cast %4 : vector<1x4x1xf32> to vector<4x1xf32>
    %6 = vector.extract_strided_slice %3 {offsets = [1, 0, 0], sizes = [1, 4, 1], strides = [1, 1, 1]} : vector<3x4x1xf32> to vector<1x4x1xf32>
    %7 = vector.shape_cast %6 : vector<1x4x1xf32> to vector<4x1xf32>
    %8 = vector.extract_strided_slice %3 {offsets = [2, 0, 0], sizes = [1, 4, 1], strides = [1, 1, 1]} : vector<3x4x1xf32> to vector<1x4x1xf32>
    %9 = vector.shape_cast %8 : vector<1x4x1xf32> to vector<4x1xf32>
    %c0_4 = arith.constant 0 : index
    %c0_5 = arith.constant 0 : index
    %10 = vector.load %arg1[%c0_4, %c0_5] : memref<4x1xf32, #tpu.memory_space<vmem>>, vector<4x1xf32>
    %cst_6 = arith.constant 2.000000e+00 : f32
    %11 = vector.broadcast %cst_6 : f32 to vector<4x1xf32>
    %12 = arith.mulf %11, %5 : vector<4x1xf32>
    %cst_7 = arith.constant 9.99999974E-6 : f32
    %13 = vector.broadcast %cst_7 : f32 to vector<4x1xf32>
    %14 = arith.addf %12, %13 : vector<4x1xf32>
    %15 = arith.addf %7, %9 : vector<4x1xf32>
    %cst_8 = arith.constant 9.99999974E-6 : f32
    %16 = vector.broadcast %cst_8 : f32 to vector<4x1xf32>
    %17 = arith.addf %15, %16 : vector<4x1xf32>
    %18 = arith.divf %14, %17 : vector<4x1xf32>
    %cst_9 = arith.constant 9.99999974E-6 : f32
    %19 = vector.broadcast %cst_9 : f32 to vector<4x1xf32>
    %20 = arith.addf %5, %19 : vector<4x1xf32>
    %21 = arith.addf %7, %9 : vector<4x1xf32>
    %22 = arith.subf %21, %5 : vector<4x1xf32>
    %cst_10 = arith.constant 9.99999974E-6 : f32
    %23 = vector.broadcast %cst_10 : f32 to vector<4x1xf32>
    %24 = arith.addf %22, %23 : vector<4x1xf32>
    %25 = arith.divf %20, %24 : vector<4x1xf32>
    %26 = arith.mulf %10, %18 : vector<4x1xf32>
    %27 = vector.shape_cast %26 : vector<4x1xf32> to vector<1x4x1xf32>
    %cst_11 = arith.constant dense<0.000000e+00> : vector<1xf32>
    %28 = vector.multi_reduction <add>, %27, %cst_11 [1, 2] : vector<1x4x1xf32> to vector<1xf32>
    %29 = vector.shape_cast %28 : vector<1xf32> to vector<1x1x1xf32>
    %30 = vector.extract %29[0, 0, 0] : f32 from vector<1x1x1xf32>
    %31 = vector.broadcast %30 : f32 to vector<1x1xf32>
    %32 = vector.shape_cast %10 : vector<4x1xf32> to vector<1x4x1xf32>
    %cst_12 = arith.constant dense<0.000000e+00> : vector<1xf32>
    %33 = vector.multi_reduction <add>, %32, %cst_12 [1, 2] : vector<1x4x1xf32> to vector<1xf32>
    %34 = vector.shape_cast %33 : vector<1xf32> to vector<1x1x1xf32>
    %35 = vector.extract %34[0, 0, 0] : f32 from vector<1x1x1xf32>
    %36 = vector.broadcast %35 : f32 to vector<1x1xf32>
    %37 = arith.divf %31, %36 : vector<1x1xf32>
    %cst_13 = arith.constant 1.000000e+00 : f32
    %38 = vector.broadcast %cst_13 : f32 to vector<1x1xf32>
    %39 = arith.subf %38, %37 : vector<1x1xf32>
    %40 = vector.shape_cast %18 : vector<4x1xf32> to vector<1x4x1xf32>
    %cst_14 = arith.constant dense<0.000000e+00> : vector<1xf32>
    %41 = vector.multi_reduction <add>, %40, %cst_14 [1, 2] : vector<1x4x1xf32> to vector<1xf32>
    %42 = vector.shape_cast %41 : vector<1xf32> to vector<1x1x1xf32>
    %43 = vector.extract %42[0, 0, 0] : f32 from vector<1x1x1xf32>
    %44 = vector.broadcast %43 : f32 to vector<1x1xf32>
    %cst_15 = arith.constant 4.000000e+00 : f32
    %45 = vector.broadcast %cst_15 : f32 to vector<1x1xf32>
    %46 = arith.divf %44, %45 : vector<1x1xf32>
    %47 = vector.shape_cast %25 : vector<4x1xf32> to vector<1x4x1xf32>
    %cst_16 = arith.constant dense<0.000000e+00> : vector<1xf32>
    %48 = vector.multi_reduction <add>, %47, %cst_16 [1, 2] : vector<1x4x1xf32> to vector<1xf32>
    %49 = vector.shape_cast %48 : vector<1xf32> to vector<1x1x1xf32>
    %50 = vector.extract %49[0, 0, 0] : f32 from vector<1x1x1xf32>
    %51 = vector.broadcast %50 : f32 to vector<1x1xf32>
    %cst_17 = arith.constant 4.000000e+00 : f32
    %52 = vector.broadcast %cst_17 : f32 to vector<1x1xf32>
    %53 = arith.divf %51, %52 : vector<1x1xf32>
    %c0_18 = arith.constant 0 : index
    %c0_19 = arith.constant 0 : index
    %54 = vector.load %arg2[%c0_18, %c0_19] : memref<2x2xf32, #tpu.memory_space<vmem>>, vector<2x2xf32>
    %c0_20 = arith.constant 0 : index
    %c0_21 = arith.constant 0 : index
    %55 = vector.load %arg3[%c0_20, %c0_21] : memref<2x2xf32, #tpu.memory_space<vmem>>, vector<2x2xf32>
    %c0_22 = arith.constant 0 : index
    %c0_23 = arith.constant 0 : index
    %56 = vector.load %arg4[%c0_22, %c0_23] : memref<1x2xf32, #tpu.memory_space<vmem>>, vector<1x2xf32>
    %cst_24 = arith.constant dense<0xFF800000> : vector<2xf32>
    %57 = vector.multi_reduction <maximumf>, %54, %cst_24 [1] : vector<2x2xf32> to vector<2xf32>
    %58 = vector.shape_cast %57 : vector<2xf32> to vector<2x1xf32>
    %59 = vector.broadcast %58 : vector<2x1xf32> to vector<2x2xf32>
    %60 = arith.subf %54, %59 : vector<2x2xf32>
    %61 = math.exp %60 : vector<2x2xf32>
    %cst_25 = arith.constant dense<0.000000e+00> : vector<2xf32>
    %62 = vector.multi_reduction <add>, %61, %cst_25 [1] : vector<2x2xf32> to vector<2xf32>
    %63 = vector.shape_cast %62 : vector<2xf32> to vector<2x1xf32>
    %64 = math.log %63 : vector<2x1xf32>
    %65 = arith.addf %58, %64 : vector<2x1xf32>
    %66 = vector.broadcast %65 : vector<2x1xf32> to vector<2x2xf32>
    %67 = arith.subf %54, %66 : vector<2x2xf32>
    %68 = vector.broadcast %56 : vector<1x2xf32> to vector<2x2xf32>
    %69 = arith.mulf %55, %68 : vector<2x2xf32>
    %cst_26 = arith.constant dense<0.000000e+00> : vector<2xf32>
    %70 = vector.multi_reduction <add>, %69, %cst_26 [1] : vector<2x2xf32> to vector<2xf32>
    %71 = vector.shape_cast %70 : vector<2xf32> to vector<2x1xf32>
    %72 = arith.mulf %55, %67 : vector<2x2xf32>
    %cst_27 = arith.constant dense<0.000000e+00> : vector<2xf32>
    %73 = vector.multi_reduction <add>, %72, %cst_27 [1] : vector<2x2xf32> to vector<2xf32>
    %74 = vector.shape_cast %73 : vector<2xf32> to vector<2x1xf32>
    %cst_28 = arith.constant 0.000000e+00 : f32
    %75 = vector.broadcast %cst_28 : f32 to vector<2x1xf32>
    %76 = arith.subf %75, %74 : vector<2x1xf32>
    %77 = arith.mulf %71, %76 : vector<2x1xf32>
    %78 = vector.shape_cast %77 : vector<2x1xf32> to vector<1x2x1xf32>
    %cst_29 = arith.constant dense<0.000000e+00> : vector<1xf32>
    %79 = vector.multi_reduction <add>, %78, %cst_29 [1, 2] : vector<1x2x1xf32> to vector<1xf32>
    %80 = vector.shape_cast %79 : vector<1xf32> to vector<1x1x1xf32>
    %81 = vector.extract %80[0, 0, 0] : f32 from vector<1x1x1xf32>
    %82 = vector.broadcast %81 : f32 to vector<1x1xf32>
    %83 = vector.shape_cast %71 : vector<2x1xf32> to vector<1x2x1xf32>
    %cst_30 = arith.constant dense<0.000000e+00> : vector<1xf32>
    %84 = vector.multi_reduction <add>, %83, %cst_30 [1, 2] : vector<1x2x1xf32> to vector<1xf32>
    %85 = vector.shape_cast %84 : vector<1xf32> to vector<1x1x1xf32>
    %86 = vector.extract %85[0, 0, 0] : f32 from vector<1x1x1xf32>
    %87 = vector.broadcast %86 : f32 to vector<1x1xf32>
    %88 = arith.divf %82, %87 : vector<1x1xf32>
    %cst_31 = arith.constant 5.000000e-01 : f32
    %89 = vector.broadcast %cst_31 : f32 to vector<1x1xf32>
    %90 = arith.mulf %89, %39 : vector<1x1xf32>
    %cst_32 = arith.constant 5.000000e-01 : f32
    %91 = vector.broadcast %cst_32 : f32 to vector<1x1xf32>
    %92 = arith.mulf %91, %88 : vector<1x1xf32>
    %93 = arith.addf %90, %92 : vector<1x1xf32>
    %94 = tpu.iota {dimensions = array<i32: 1>} : vector<1x8xi32>
    %c0_i32 = arith.constant 0 : i32
    %95 = vector.broadcast %c0_i32 : i32 to vector<1x8xi32>
    %96 = arith.cmpi eq, %94, %95 : vector<1x8xi32>
    %cst_33 = arith.constant 0.000000e+00 : f32
    %97 = vector.shape_cast %93 : vector<1x1xf32> to vector<1x1xf32>
    %98 = vector.broadcast %97 : vector<1x1xf32> to vector<1x8xf32>
    %99 = vector.broadcast %cst_33 : f32 to vector<1x8xf32>
    %100 = arith.select %96, %98, %99 : vector<1x8xi1>, vector<1x8xf32>
    %c1_i32 = arith.constant 1 : i32
    %101 = vector.broadcast %c1_i32 : i32 to vector<1x8xi32>
    %102 = arith.cmpi eq, %94, %101 : vector<1x8xi32>
    %103 = vector.shape_cast %39 : vector<1x1xf32> to vector<1x1xf32>
    %104 = vector.broadcast %103 : vector<1x1xf32> to vector<1x8xf32>
    %105 = arith.select %102, %104, %100 : vector<1x8xi1>, vector<1x8xf32>
    %c2_i32 = arith.constant 2 : i32
    %106 = vector.broadcast %c2_i32 : i32 to vector<1x8xi32>
    %107 = arith.cmpi eq, %94, %106 : vector<1x8xi32>
    %108 = vector.shape_cast %88 : vector<1x1xf32> to vector<1x1xf32>
    %109 = vector.broadcast %108 : vector<1x1xf32> to vector<1x8xf32>
    %110 = arith.select %107, %109, %105 : vector<1x8xi1>, vector<1x8xf32>
    %c3_i32 = arith.constant 3 : i32
    %111 = vector.broadcast %c3_i32 : i32 to vector<1x8xi32>
    %112 = arith.cmpi eq, %94, %111 : vector<1x8xi32>
    %113 = vector.shape_cast %46 : vector<1x1xf32> to vector<1x1xf32>
    %114 = vector.broadcast %113 : vector<1x1xf32> to vector<1x8xf32>
    %115 = arith.select %112, %114, %110 : vector<1x8xi1>, vector<1x8xf32>
    %c4_i32 = arith.constant 4 : i32
    %116 = vector.broadcast %c4_i32 : i32 to vector<1x8xi32>
    %117 = arith.cmpi eq, %94, %116 : vector<1x8xi32>
    %118 = vector.shape_cast %53 : vector<1x1xf32> to vector<1x1xf32>
    %119 = vector.broadcast %118 : vector<1x1xf32> to vector<1x8xf32>
    %120 = arith.select %117, %119, %115 : vector<1x8xi1>, vector<1x8xf32>
    %c0_34 = arith.constant 0 : index
    %c0_35 = arith.constant 0 : index
    %121 = vector.load %arg5[%c0_34, %c0_35] : memref<1x8xf32, #tpu.memory_space<vmem>>, vector<1x8xf32>
    tpu.vector_store %arg5[%c0_34, %c0_35], %120 {strides = array<i32>} : memref<1x8xf32, #tpu.memory_space<vmem>>, vector<1x8xf32>,
    return
  }
}

</mosaic_0001>

<bundles_post_ra>
// kernel: awl4_forward.3
= control target key start
LH: loop header
LB: loop body
LE: loop exit
PB: predicated region body
PF: predicated region fallthrough
CT: control target
= control target key end

     0   :  { %vm112_vm0 = vcmask 9216   ;;  %vm26_vm1 = vcmask 1043456   ;;  %vm58_vm2 = vcmask 3072   ;;  %vm142_vm3 = vcmask 1024   ;;  %s298_s2 = inlined_call_operand.vmem [shape: f32[2,2], index: 2, kind: input, shape index: {}]   ;;  %s299_s0 = inlined_call_operand.vmem [shape: f32[2,3,4,128], index: 0, kind: input, shape index: {}]   ;;  %s300_s3 = inlined_call_operand.vmem [shape: f32[2,2], index: 3, kind: input, shape index: {}]   ;;  %s301_s4 = inlined_call_operand.vmem [shape: f32[1,2], index: 4, kind: input, shape index: {}]   ;;  %s302_s1 = inlined_call_operand.vmem [shape: f32[4,1], index: 1, kind: input, shape index: {}]   ;;  %s303_s5 = inlined_call_operand.vmem [shape: f32[1,8], index: 5, kind: output, shape index: {}]  }
   0x1   :  { %v246_v0 = vld [vmem:[%s298_s2] sm:$0x3]  ;;  %v21_v2 = vld [vmem:[%s299_s0 + $0x4] sm:$0xf]  ;;  %v24_v3 = vld [vmem:[%s299_s0 + $0x10] sm:$0xf] }
   0x2   :  { %v113_v1 = vsel %vm112_vm0, %v246_v0, -inf  ;;  %v22_v4 = vld [vmem:[%s299_s0 + $0x8] sm:$0xf]  ;;  %v30_v5 = vsel %vm26_vm1, %v21_v2, 0.0  ;;  %v31_v6 = vsel %vm26_vm1, %v24_v3, 0.0  ;;  %vm182_vm9 = vcmask 57344  }
   0x3   :  { %114 = vmax.xlane.f32.xlu0 %v113_v1  ;;  %v25_v7 = vld [vmem:[%s299_s0 + $0x14] sm:$0xf]  ;;  %v33_v8 = vsel %vm26_vm1, %v22_v4, 0.0  ;;  %v32_v9 = vadd.f32 %v31_v6, %v30_v5  ;;  %v20_v11 = vld [vmem:[%s299_s0] sm:$0xf] }
   0x4   :  { %v34_v10 = vsel %vm26_vm1, %v25_v7, 0.0  ;;  %v23_v12 = vld [vmem:[%s299_s0 + $0xc] sm:$0xf]  ;;  %v27_v14 = vsel %vm26_vm1, %v20_v11, 0.0  ;;  %v110_v25 = vld [vmem:[%s300_s3] sm:$0x3] }
   0x5   :  { %v35_v13 = vadd.f32 %v34_v10, %v33_v8  ;;  %v28_v15 = vsel %vm26_vm1, %v23_v12, 0.0  ;;  %v39_v16 = vsel %vm26_vm1, %v32_v9, 0.0  ;;  %v188_v26 = vld [vmem:[%s301_s4] ss:$0 sm:$0xff] }
   0x6   :  { %v29_v17 = vadd.f32 %v28_v15, %v27_v14  ;;  %40 = vadd.xlane.f32.xlu1 %v39_v16  ;;  %v132_v27 = vmul.f32 %v188_v26, %v110_v25  ;;  %v45_v29 = vld [vmem:[%s302_s1] sm:$0xf] }
   0x7   :  { %v42_v18 = vsel %vm26_vm1, %v35_v13, 0.0  ;;  %v70_v30 = vsel %vm58_vm2, %v45_v29, 0.0 }
   0x8   :  { %v36_v19 = vsel %vm26_vm1, %v29_v17, 0.0  ;;  %v133_v28 = vsel %vm112_vm0, %v132_v27, 0.0 }
   0xa   :  { %43 = vadd.xlane.f32.xlu1 %v42_v18 }
  0x90   :  { %v115_v20 = vpop.xlane.xlu0 %114 }
  0x91   :  { %v116_v21 = vsub.f32 %v246_v0, %v115_v20 }
  0x93   :  { %v117_v22 = vmul.f32 1.442695, %v116_v21  ;;  %v41_v31 = vpop.xlane.xlu1 %40 }
  0x95   :  { %201 = vpow2.f32 %v117_v22 }
  0x97   :  { %v44_v32 = vpop.xlane.xlu1 %43 }
  0x98   :  { %v48_v33 = vadd.f32 %v44_v32, %v41_v31 }
  0x9a   :  { %v49_v34 = vadd.f32 1e-05, %v48_v33 }
  0x9c   :  { %203 = vrcp.f32 %v49_v34 }
  0x9f   :  { %v202_v23 = vpop.eup %201 }
  0xa0   :  { %v119_v24 = vsel %vm112_vm0, %v202_v23, 0.0 }
  0xa1   :  { %120 = vadd.xlane.f32.xlu0 %v119_v24 }
  0xa5   :  { %37 = vadd.xlane.f32.xlu0 %v36_v19 }
  0xa6   :  { %v204_v40 = vpop.eup %203 }
  0xa9   :  { %134 = vadd.xlane.f32.xlu0 %v133_v28 }
  0xad   :  { %71 = vadd.xlane.f32.xlu0 %v70_v30 }
 0x12e   :  { %v121_v35 = vpop.xlane.xlu0 %120 }
 0x12f   :  { %205 = vlog2.f32 %v121_v35 }
 0x132   :  { %v38_v36 = vpop.xlane.xlu0 %37 }
 0x133   :  { %v53_v37 = vsub.f32 %v48_v33, %v38_v36  ;;  %v46_v38 = vmul.f32 2.0, %v38_v36  ;;  %v52_v47 = vadd.f32 1e-05, %v38_v36 }
 0x135   :  { %v54_v39 = vadd.f32 1e-05, %v53_v37  ;;  %v47_v41 = vadd.f32 1e-05, %v46_v38 }
 0x136   :  { %v135_v56 = vpop.xlane.xlu0 %134 }
 0x137   :  { %207 = vrcp.f32 %v54_v39  ;;  %v51_v45 = vmul.f32 %v204_v40, %v47_v41  ;;  %v154_v57 = vsel %vm142_vm3, %v135_v56, 0.0 }
 0x139   :  { %v206_v42 = vpop.eup %205  ;;  %v57_v49 = vmul.f32 %v51_v45, %v45_v29  ;;  %v84_v55 = vsel %vm58_vm2, %v51_v45, 0.0  ;;  %v170_v45 = vlaneseq }
 0x13a   :  { %v123_v43 = vmul.f32 0.6931472, %v206_v42  ;;  %v72_v58 = vpop.xlane.xlu0 %71 }
 0x13b   :  { %v59_v53 = vsel %vm58_vm2, %v57_v49, 0.0  ;;  %v73_v59 = vrot.slane %v72_v58, 4  ;;  %v171_v49 = vand.u32 127, %v170_v45 }
 0x13c   :  { %v124_v44 = vadd.f32 %v123_v43, %v115_v20 }
 0x13d   :  { %v74_v60 = vadd.f32 %v73_v59, %v72_v58  ;;  %vm172_vm4 = vcmp.eq.s32.totalorder %v171_v49, 0  ;;  %vm174_vm5 = vcmp.eq.s32.totalorder %v171_v49, 1  ;;  %vm176_vm6 = vcmp.eq.s32.totalorder %v171_v49, 2 }
 0x13e   :  { %v125_v46 = vsub.f32 %v246_v0, %v124_v44  ;;  %vm178_vm7 = vcmp.eq.s32.totalorder %v171_v49, 3  ;;  %vm180_vm8 = vcmp.eq.s32.totalorder %v171_v49, 4 }
 0x13f   :  { %v75_v63 = vrot.slane %v74_v60, 2 }
 0x140   :  { %v136_v48 = vmul.f32 %v125_v46, %v110_v25 }
 0x141   :  { %v208_v50 = vpop.eup %207  ;;  %v76_v7 = vadd.f32 %v75_v63, %v74_v60 }
 0x142   :  { %v137_v51 = vsel %vm112_vm0, %v136_v48, 0.0  ;;  %v56_v52 = vmul.f32 %v208_v50, %v52_v47 }
 0x143   :  { %138 = vadd.xlane.f32.xlu1 %v137_v51  ;;  %v77_v13 = vrot.slane %v76_v7, 1 }
 0x144   :  { %v97_v54 = vsel %vm58_vm2, %v56_v52, 0.0 }
 0x145   :  { %98 = vadd.xlane.f32.xlu0 %v97_v54  ;;  %v78_v19 = vadd.f32 %v77_v13, %v76_v7 }
 0x147   :  { %60 = vadd.xlane.f32.xlu1 %v59_v53 }
 0x149   :  { %155 = vadd.xlane.f32.xlu0 %v154_v57 }
 0x14b   :  { %85 = vadd.xlane.f32.xlu1 %v84_v55 }
 0x1d0   :  { %v139_v61 = vpop.xlane.xlu1 %138 }
 0x1d1   :  { %v140_v62 = vsub.f32 0.0, %v139_v61 }
 0x1d2   :  { %v99_v0 = vpop.xlane.xlu0 %98 }
 0x1d3   :  { %v141_v1 = vmul.f32 %v140_v62, %v135_v56  ;;  %v100_v2 = vrot.slane %v99_v0, 4 }
 0x1d4   :  { %v61_v3 = vpop.xlane.xlu1 %60 }
 0x1d5   :  { %v143_v4 = vsel %vm142_vm3, %v141_v1, 0.0  ;;  %v62_v5 = vrot.slane %v61_v3, 4  ;;  %v101_v6 = vadd.f32 %v100_v2, %v99_v0 }
 0x1d6   :  { %144 = vadd.xlane.f32.xlu1 %v143_v4  ;;  %v156_v26 = vpop.xlane.xlu0 %155 }
 0x1d7   :  { %v63_v8 = vadd.f32 %v62_v5, %v61_v3  ;;  %v102_v9 = vrot.slane %v101_v6, 2  ;;  %v157_v27 = vrot.slane %v156_v26, 4 }
 0x1d8   :  { %v86_v10 = vpop.xlane.xlu1 %85 }
 0x1d9   :  { %v64_v11 = vrot.slane %v63_v8, 2  ;;  %v87_v12 = vrot.slane %v86_v10, 4  ;;  %v103_v14 = vadd.f32 %v102_v9, %v101_v6  ;;  %v158_v28 = vadd.f32 %v157_v27, %v156_v26 }
 0x1db   :  { %v88_v15 = vadd.f32 %v87_v12, %v86_v10  ;;  %v65_v16 = vadd.f32 %v64_v11, %v63_v8  ;;  %v104_v20 = vrot.slane %v103_v14, 1  ;;  %v159_v29 = vrot.slane %v158_v28, 2 }
 0x1dd   :  { %v89_v17 = vrot.slane %v88_v15, 2  ;;  %v66_v18 = vrot.slane %v65_v16, 1  ;;  %v105_v24 = vadd.f32 %v104_v20, %v103_v14  ;;  %v160_v33 = vadd.f32 %v159_v29, %v158_v28 }
 0x1df   :  { %v67_v21 = vadd.f32 %v66_v18, %v65_v16  ;;  %v90_v22 = vadd.f32 %v89_v17, %v88_v15  ;;  %v161_v36 = vrot.slane %v160_v33, 1 }
 0x1e1   :  { %189 = vpush %v67_v21  ;;  %v91_v23 = vrot.slane %v90_v22, 1  ;;  %v162_v39 = vadd.f32 %v161_v36, %v160_v33 }
 0x1e2   :  { %191 = vpush %v78_v19 }
 0x1e3   :  { %v92_v25 = vadd.f32 %v91_v23, %v90_v22 }
 0x1e5   :  { %193 = vpush %v92_v25 }
 0x1e6   :  { %195 = vpush %v105_v24 }
 0x212   :  { %s190_s1 = spop %189 }
 0x213   :  { %s192_s3 = spop %191  ;;  %v69_v43 = vstv %s190_s1 }
 0x214   :  { %v80_v40 = vstv %s192_s3 }
 0x215   :  { %209 = vrcp.f32 %v80_v40 }
 0x216   :  { %s194_s4 = spop %193 }
 0x217   :  { %s196_s11 = spop %195  ;;  %v94_v53 = vstv %s194_s4 }
 0x218   :  { %v107_v55 = vstv %s196_s11  ;;  %v96_v57 = vmul.f32 0.25, %v94_v53 }
 0x219   :  { %v108_v59 = vmul.f32 0.25, %v107_v55 }
 0x21f   :  { %v210_v42 = vpop.eup %209 }
 0x220   :  { %v82_v44 = vmul.f32 %v210_v42, %v69_v43 }
 0x222   :  { %v83_v46 = vsub.f32 1.0, %v82_v44 }
 0x224   :  { %v167_v51 = vmul.f32 0.5, %v83_v46 }
 0x263   :  { %v145_v30 = vpop.xlane.xlu1 %144 }
 0x264   :  { %v146_v31 = vrot.slane %v145_v30, 4 }
 0x266   :  { %v147_v32 = vadd.f32 %v146_v31, %v145_v30 }
 0x268   :  { %v148_v34 = vrot.slane %v147_v32, 2 }
 0x26a   :  { %v149_v35 = vadd.f32 %v148_v34, %v147_v32 }
 0x26c   :  { %v150_v37 = vrot.slane %v149_v35, 1 }
 0x26e   :  { %v151_v38 = vadd.f32 %v150_v37, %v149_v35 }
 0x270   :  { %197 = vpush %v151_v38 }
 0x271   :  { %199 = vpush %v162_v39 }
 0x2a1   :  { %s198_s12 = spop %197 }
 0x2a2   :  { %s200_s13 = spop %199  ;;  %v153_v48 = vstv %s198_s12 }
 0x2a3   :  { %v164_v41 = vstv %s200_s13 }
 0x2a4   :  { %211 = vrcp.f32 %v164_v41 }
 0x2ae   :  { %v212_v47 = vpop.eup %211 }
 0x2af   :  { %v166_v50 = vmul.f32 %v212_v47, %v153_v48 }
 0x2b1   :  { %v168_v52 = vmul.f32 0.5, %v166_v50 }
 0x2b3   :  { %v169_v54 = vadd.f32 %v168_v52, %v167_v51 }
 0x2b5   :  { %v173_v56 = vsel %vm172_vm4, %v169_v54, 0.0 }
 0x2b6   :  { %v175_v58 = vsel %vm174_vm5, %v83_v46, %v173_v56 }
 0x2b7   :  { %v177_v60 = vsel %vm176_vm6, %v166_v50, %v175_v58 }
 0x2b8   :  { %v179_v61 = vsel %vm178_vm7, %v96_v57, %v177_v60 }
 0x2b9   :  { %v181_v62 = vsel %vm180_vm8, %v108_v59, %v179_v61 }
 0x2ba   :  { %183 = vst.msk [vmem:[%s303_s5] sm:$0x1] %vm182_vm9, %v181_v62 }

// kernel: awl4_forward.2
= control target key start
LH: loop header
LB: loop body
LE: loop exit
PB: predicated region body
PF: predicated region fallthrough
CT: control target
= control target key end

     0   :  { %s606_s9 = smov 0   ;;  %s608_s10 = smov 0   ;;  %s696_s0 = inlined_call_operand.vmem [shape: f32[2,4,2,128], index: 0, kind: input, shape index: {}]   ;;  %s697_s1 = inlined_call_operand.vmem [shape: s32[2,1,2,128], index: 1, kind: input, shape index: {}]   ;;  %s698_s2 = inlined_call_operand.vmem [shape: f32[2,3,4,128], index: 2, kind: output, shape index: {}]  }
   0x1   :  { %s610_s11 = smov 0  }
   0x2 LB: > { %s24_s12 = sadd.s32 1, %s584_s10  ;;  %p507_p0 = scmp.ge.s32.totalorder %s588_s11, 1  ;;  %s588_s11 = sphi %s610_s11, %s12_s11   ;;  %s584_s10 = sphi %s608_s10, %s700_s10   ;;  %s580_s9 = sphi %s606_s9, %s699_s9  }
   0x3   : > { %p26_p1 = scmp.ge.s32.totalorder %s24_s12, 2  ;;  %p143_p2 = scmp.lt.s32.totalorder %s588_s11, 3 }
   0x5   : > { %s702_s12 = smov (%p26_p1, %s24_s12), 0  ;;  %p144_p3 = pnand %p507_p0, %p143_p2 }
   0x6   : > { %p175_p4 = scmp.lt.s32.totalorder (!%p144_p3), %s580_s9, 1  ;;  %v590_v0 = vmov (!%p144_p3), 0.0   ;;  %vm309_vm4 = vcmask (!%p144_p3), 1041408  }
   0x7   : > { %147 = sbr.rel (%p144_p3) target bundleno = 89 (0x59), region = 28  ;;  %207 = vst [vmem:[#allocation2 + $0x10] sm:$0x3] (!%p144_p3), %v590_v0  ;;  %199 = vst [vmem:[#allocation2] sm:$0x3] (!%p144_p3), %v590_v0 }
   0x8   : > { %200 = vst [vmem:[#allocation2 + $0x2] sm:$0x3] (!%p144_p3), %v590_v0  ;;  %201 = vst [vmem:[#allocation2 + $0x4] sm:$0x3] (!%p144_p3), %v590_v0 }
   0x9   : > { %202 = vst [vmem:[#allocation2 + $0x6] sm:$0x3] (!%p144_p3), %v590_v0  ;;  %203 = vst [vmem:[#allocation2 + $0x8] sm:$0x3] (!%p144_p3), %v590_v0 }
   0xa   : > { %204 = vst [vmem:[#allocation2 + $0xa] sm:$0x3] (!%p144_p3), %v590_v0  ;;  %205 = vst [vmem:[#allocation2 + $0xc] sm:$0x3] (!%p144_p3), %v590_v0 }
   0xb   : > { %206 = vst [vmem:[#allocation2 + $0xe] sm:$0x3] (!%p144_p3), %v590_v0  ;;  %208 = vst [vmem:[#allocation2 + $0x12] sm:$0x3] (!%p144_p3), %v590_v0 }
   0xc   : > { %209 = vst [vmem:[#allocation2 + $0x14] sm:$0x3] (!%p144_p3), %v590_v0  ;;  %210 = vst [vmem:[#allocation2 + $0x16] sm:$0x3] (!%p144_p3), %v590_v0 }
   0xe   : > { %s704_s9 = smov (!%p175_p4, %s580_s9), 1  ;;  %v249_v3 = vld [vmem:[#allocation2 + $0x10] sm:$0x3] }
   0xf   : > { %s529_s13 = sshll.u32 %s704_s9, 3  ;;  %s510_s14 = sshll.u32 %s704_s9, 1 }
  0x10   : > { %s182_s17 = scalar_lea.vmem %s696_s0, %s529_s13  ;;  %s189_s20 = scalar_lea.vmem %s697_s1, %s510_s14 }
  0x11   : > { %v635_v1 = vld [vmem:[%s189_s20] sm:$0x3]  ;;  %v512_v15 = vld [vmem:[%s182_s17 + $0x2] sm:$0x3]  ;;  %v513_v16 = vld [vmem:[%s182_s17 + $0x4] sm:$0x3] }
  0x12   : > { %vm239_vm0 = vcmp.eq.s32.totalorder %v635_v1, 0  ;;  %vm255_vm1 = vcmp.eq.s32.totalorder %v635_v1, 1  ;;  %vm272_vm2 = vcmp.eq.s32.totalorder %v635_v1, 2  ;;  %vm289_vm3 = vcmp.eq.s32.totalorder %v635_v1, 3  ;;  %v212_v2 = vld [vmem:[%s182_s17] sm:$0x3] }
  0x13   : > { %v515_v4 = vsel %vm239_vm0, 1.0, %v590_v0  ;;  %v266_v5 = vld [vmem:[#allocation2 + $0x12] sm:$0x3]  ;;  %v516_v6 = vsel %vm255_vm1, 1.0, %v590_v0  ;;  %v283_v9 = vld [vmem:[#allocation2 + $0x14] sm:$0x3]  ;;  %v219_v17 = vmax.f32 %v212_v2, %v512_v15 }
  0x14   : > { %v252_v7 = vadd.f32 %v515_v4, %v249_v3  ;;  %v269_v8 = vadd.f32 %v516_v6, %v266_v5  ;;  %v517_v10 = vsel %vm272_vm2, 1.0, %v590_v0  ;;  %v300_v11 = vld [vmem:[#allocation2 + $0x16] sm:$0x3]  ;;  %v518_v12 = vsel %vm289_vm3, 1.0, %v590_v0  ;;  %v514_v18 = vld [vmem:[%s182_s17 + $0x6] sm:$0x3] }
  0x15   : > { %v286_v13 = vadd.f32 %v517_v10, %v283_v9  ;;  %v303_v14 = vadd.f32 %v518_v12, %v300_v11  ;;  %v220_v19 = vmax.f32 %v219_v17, %v513_v16  ;;  %s530_s21 = smul.u32 12, %s704_s9  ;;  %v245_v5 = vld [vmem:[#allocation2 + $0x8] sm:$0x3]  ;;  %v296_v9 = vld [vmem:[#allocation2 + $0xe] sm:$0x3] }
  0x16   : > { %253 = vst [vmem:[#allocation2 + $0x10] sm:$0x3] %v252_v7  ;;  %270 = vst [vmem:[#allocation2 + $0x12] sm:$0x3] %v269_v8  ;;  %v262_v7 = vld [vmem:[#allocation2 + $0xa] sm:$0x3] }
  0x17   : > { %287 = vst [vmem:[#allocation2 + $0x14] sm:$0x3] %v286_v13  ;;  %304 = vst [vmem:[#allocation2 + $0x16] sm:$0x3] %v303_v14  ;;  %v221_v20 = vmax.f32 %v220_v19, %v514_v18  ;;  %s657_s24 = scalar_lea.vmem %s698_s2, %s530_s21  ;;  %v279_v8 = vld [vmem:[#allocation2 + $0xc] sm:$0x3] }
  0x18   : > { %v240_v14 = vld [vmem:[#allocation2] sm:$0x3]  ;;  %v291_v17 = vld [vmem:[#allocation2 + $0x6] sm:$0x3] }
  0x19   : > { %v222_v21 = vsub.f32 %v212_v2, %v221_v20  ;;  %v225_v22 = vsub.f32 %v512_v15, %v221_v20  ;;  %v228_v23 = vsub.f32 %v513_v16, %v221_v20  ;;  %v231_v24 = vsub.f32 %v514_v18, %v221_v20  ;;  %v257_v15 = vld [vmem:[#allocation2 + $0x2] sm:$0x3]  ;;  %v274_v16 = vld [vmem:[#allocation2 + $0x4] sm:$0x3] }
  0x1b   : > { %v223_v27 = vmul.f32 1.442695, %v222_v21  ;;  %v226_v28 = vmul.f32 1.442695, %v225_v22  ;;  %v229_v29 = vmul.f32 1.442695, %v228_v23 }
  0x1c   : > { %v232_v30 = vmul.f32 1.442695, %v231_v24 }
  0x1d   : > { %v382_v25 = vld [vmem:[#allocation2 + $0x10] sm:$0x3]  ;;  %v392_v26 = vld [vmem:[#allocation2 + $0x12] sm:$0x3]  ;;  %556 = vpow2.f32 %v223_v27 }
  0x1e   : > { %v383_v31 = vsel %vm309_vm4, %v382_v25, 0.0  ;;  %v393_v32 = vsel %vm309_vm4, %v392_v26, 0.0  ;;  %v401_v33 = vld [vmem:[#allocation2 + $0x14] sm:$0x3]  ;;  %v410_v37 = vld [vmem:[#allocation2 + $0x16] sm:$0x3]  ;;  %558 = vpow2.f32 %v226_v28 }
  0x1f   : > { %v384_v34 = vrot.slane %v383_v31, 4  ;;  %v394_v35 = vrot.slane %v393_v32, 4  ;;  %v402_v36 = vsel %vm309_vm4, %v401_v33, 0.0  ;;  %v411_v39 = vsel %vm309_vm4, %v410_v37, 0.0 }
  0x20   : > { %v403_v38 = vrot.slane %v402_v36, 4  ;;  %560 = vpow2.f32 %v229_v29  ;;  %v412_v42 = vrot.slane %v411_v39, 4 }
  0x21   : > { %v385_v40 = vadd.f32 %v384_v34, %v383_v31  ;;  %v395_v41 = vadd.f32 %v394_v35, %v393_v32  ;;  %562 = vpow2.f32 %v232_v30 }
  0x22   : > { %v404_v43 = vadd.f32 %v403_v38, %v402_v36  ;;  %v413_v46 = vadd.f32 %v412_v42, %v411_v39 }
  0x23   : > { %v386_v44 = vrot.slane %v385_v40, 2  ;;  %v396_v45 = vrot.slane %v395_v41, 2 }
  0x24   : > { %v405_v47 = vrot.slane %v404_v43, 2  ;;  %v414_v50 = vrot.slane %v413_v46, 2 }
  0x25   : > { %v387_v48 = vadd.f32 %v386_v44, %v385_v40  ;;  %v397_v49 = vadd.f32 %v396_v45, %v395_v41 }
  0x26   : > { %v406_v51 = vadd.f32 %v405_v47, %v404_v43  ;;  %v415_v54 = vadd.f32 %v414_v50, %v413_v46 }
  0x27   : > { %v388_v52 = vrot.slane %v387_v48, 1  ;;  %v398_v53 = vrot.slane %v397_v49, 1  ;;  %v557_v56 = vpop.eup %556 }
  0x28   : > { %v407_v55 = vrot.slane %v406_v51, 1  ;;  %v416_v59 = vrot.slane %v415_v54, 1  ;;  %v559_v60 = vpop.eup %558 }
  0x29   : > { %v389_v57 = vadd.f32 %v388_v52, %v387_v48  ;;  %v399_v58 = vadd.f32 %v398_v53, %v397_v49  ;;  %v234_v63 = vadd.f32 %v559_v60, %v557_v56 }
  0x2a   : > { %v408_v61 = vadd.f32 %v407_v55, %v406_v51  ;;  %v561_v62 = vpop.eup %560  ;;  %v417_v0 = vadd.f32 %v416_v59, %v415_v54 }
  0x2b   : > { %523 = vst [vmem:[%s657_s24 + $0x8] sm:$0x1] %v389_v57  ;;  %524 = vst [vmem:[%s657_s24 + $0x9] sm:$0x1] %v399_v58  ;;  %v563_v2 = vpop.eup %562  ;;  %v235_v3 = vadd.f32 %v561_v62, %v234_v63 }
  0x2c   : > { %525 = vst [vmem:[%s657_s24 + $0xa] sm:$0x1] %v408_v61  ;;  %526 = vst [vmem:[%s657_s24 + $0xb] sm:$0x1] %v417_v0 }
  0x2d   : > { %v236_v4 = vadd.f32 %v563_v2, %v235_v3 }
  0x2f   : > { %564 = vrcp.f32 %v236_v4 }
  0x39   : > { %v565_v6 = vpop.eup %564 }
  0x3a   : > { %v238_v10 = vmul.f32 %v565_v6, %v557_v56  ;;  %v254_v11 = vmul.f32 %v565_v6, %v559_v60  ;;  %v271_v12 = vmul.f32 %v565_v6, %v561_v62  ;;  %v288_v13 = vmul.f32 %v565_v6, %v563_v2 }
  0x3c   : > { %v246_v18 = vadd.f32 %v245_v5, %v238_v10  ;;  %v263_v19 = vadd.f32 %v262_v7, %v254_v11  ;;  %v280_v20 = vadd.f32 %v279_v8, %v271_v12  ;;  %v297_v21 = vadd.f32 %v296_v9, %v288_v13 }
  0x3d   : > { %v241_v22 = vsel %vm239_vm0, %v238_v10, 0.0  ;;  %v258_v23 = vsel %vm255_vm1, %v254_v11, 0.0  ;;  %v275_v24 = vsel %vm272_vm2, %v271_v12, 0.0  ;;  %v292_v25 = vsel %vm289_vm3, %v288_v13, 0.0 }
  0x3e   : > { %247 = vst [vmem:[#allocation2 + $0x8] sm:$0x3] %v246_v18  ;;  %264 = vst [vmem:[#allocation2 + $0xa] sm:$0x3] %v263_v19  ;;  %v242_v26 = vadd.f32 %v241_v22, %v240_v14  ;;  %v259_v27 = vadd.f32 %v258_v23, %v257_v15  ;;  %v276_v28 = vadd.f32 %v275_v24, %v274_v16 }
  0x3f   : > { %281 = vst [vmem:[#allocation2 + $0xc] sm:$0x3] %v280_v20  ;;  %298 = vst [vmem:[#allocation2 + $0xe] sm:$0x3] %v297_v21  ;;  %v293_v29 = vadd.f32 %v292_v25, %v291_v17 }
  0x40   : > { %243 = vst [vmem:[#allocation2] sm:$0x3] %v242_v26  ;;  %260 = vst [vmem:[#allocation2 + $0x2] sm:$0x3] %v259_v27 }
  0x41   : > { %277 = vst [vmem:[#allocation2 + $0x4] sm:$0x3] %v276_v28  ;;  %294 = vst [vmem:[#allocation2 + $0x6] sm:$0x3] %v293_v29 }
  0x45   : > { %v345_v30 = vld [vmem:[#allocation2 + $0x8] sm:$0x3]  ;;  %v355_v31 = vld [vmem:[#allocation2 + $0xa] sm:$0x3] }
  0x46   : > { %v364_v32 = vld [vmem:[#allocation2 + $0xc] sm:$0x3]  ;;  %v346_v33 = vsel %vm309_vm4, %v345_v30, 0.0  ;;  %v356_v1 = vsel %vm309_vm4, %v355_v31, 0.0  ;;  %v373_v35 = vld [vmem:[#allocation2 + $0xe] sm:$0x3] }
  0x47   : > { %v365_v34 = vsel %vm309_vm4, %v364_v32, 0.0  ;;  %v347_v36 = vrot.slane %v346_v33, 4  ;;  %v357_v37 = vrot.slane %v356_v1, 4  ;;  %v374_v39 = vsel %vm309_vm4, %v373_v35, 0.0  ;;  %v308_v40 = vld [vmem:[#allocation2] sm:$0x3] }
  0x48   : > { %v366_v38 = vrot.slane %v365_v34, 4  ;;  %v375_v41 = vrot.slane %v374_v39, 4  ;;  %v310_v42 = vsel %vm309_vm4, %v308_v40, 0.0  ;;  %v318_v43 = vld [vmem:[#allocation2 + $0x2] sm:$0x3] }
  0x49   : > { %v327_v44 = vld [vmem:[#allocation2 + $0x4] sm:$0x3]  ;;  %v348_v45 = vadd.f32 %v347_v36, %v346_v33  ;;  %v358_v46 = vadd.f32 %v357_v37, %v356_v1  ;;  %v311_v48 = vrot.slane %v310_v42, 4  ;;  %v336_v49 = vld [vmem:[#allocation2 + $0x6] sm:$0x3]  ;;  %v319_v51 = vsel %vm309_vm4, %v318_v43, 0.0 }
  0x4a   : > { %v367_v47 = vadd.f32 %v366_v38, %v365_v34  ;;  %v376_v50 = vadd.f32 %v375_v41, %v374_v39  ;;  %v328_v52 = vsel %vm309_vm4, %v327_v44, 0.0  ;;  %v337_v53 = vsel %vm309_vm4, %v336_v49, 0.0 }
  0x4b   : > { %v349_v54 = vrot.slane %v348_v45, 2  ;;  %v359_v55 = vrot.slane %v358_v46, 2  ;;  %v312_v57 = vadd.f32 %v311_v48, %v310_v42  ;;  %v320_v59 = vrot.slane %v319_v51, 4 }
  0x4c   : > { %v368_v56 = vrot.slane %v367_v47, 2  ;;  %v377_v58 = vrot.slane %v376_v50, 2  ;;  %v329_v60 = vrot.slane %v328_v52, 4  ;;  %v338_v61 = vrot.slane %v337_v53, 4 }
  0x4d   : > { %v350_v62 = vadd.f32 %v349_v54, %v348_v45  ;;  %v360_v63 = vadd.f32 %v359_v55, %v358_v46  ;;  %v313_v2 = vrot.slane %v312_v57, 2  ;;  %v321_v4 = vadd.f32 %v320_v59, %v319_v51 }
  0x4e   : > { %v369_v0 = vadd.f32 %v368_v56, %v367_v47  ;;  %v378_v3 = vadd.f32 %v377_v58, %v376_v50  ;;  %v330_v5 = vadd.f32 %v329_v60, %v328_v52  ;;  %v339_v6 = vadd.f32 %v338_v61, %v337_v53 }
  0x4f   : > { %v351_v7 = vrot.slane %v350_v62, 1  ;;  %v361_v8 = vrot.slane %v360_v63, 1  ;;  %v314_v10 = vadd.f32 %v313_v2, %v312_v57  ;;  %v322_v12 = vrot.slane %v321_v4, 2 }
  0x50   : > { %v370_v9 = vrot.slane %v369_v0, 1  ;;  %v379_v11 = vrot.slane %v378_v3, 1  ;;  %v331_v13 = vrot.slane %v330_v5, 2  ;;  %v340_v14 = vrot.slane %v339_v6, 2 }
  0x51   : > { %v352_v15 = vadd.f32 %v351_v7, %v350_v62  ;;  %v362_v16 = vadd.f32 %v361_v8, %v360_v63  ;;  %v315_v18 = vrot.slane %v314_v10, 1  ;;  %v323_v20 = vadd.f32 %v322_v12, %v321_v4 }
  0x52   : > { %v371_v17 = vadd.f32 %v370_v9, %v369_v0  ;;  %v380_v19 = vadd.f32 %v379_v11, %v378_v3  ;;  %v332_v21 = vadd.f32 %v331_v13, %v330_v5  ;;  %v341_v22 = vadd.f32 %v340_v14, %v339_v6 }
  0x53   : > { %519 = vst [vmem:[%s657_s24 + $0x4] sm:$0x1] %v352_v15  ;;  %520 = vst [vmem:[%s657_s24 + $0x5] sm:$0x1] %v362_v16  ;;  %v316_v23 = vadd.f32 %v315_v18, %v314_v10  ;;  %v324_v24 = vrot.slane %v323_v20, 1 }
  0x54   : > { %521 = vst [vmem:[%s657_s24 + $0x6] sm:$0x1] %v371_v17  ;;  %522 = vst [vmem:[%s657_s24 + $0x7] sm:$0x1] %v380_v19  ;;  %v333_v25 = vrot.slane %v332_v21, 1  ;;  %v342_v26 = vrot.slane %v341_v22, 1 }
  0x55   : > { %317 = vst [vmem:[%s657_s24] sm:$0x1] %v316_v23  ;;  %v325_v27 = vadd.f32 %v324_v24, %v323_v20 }
  0x56   : > { %v334_v28 = vadd.f32 %v333_v25, %v332_v21  ;;  %v343_v29 = vadd.f32 %v342_v26, %v341_v22 }
  0x57   : > { %326 = vst [vmem:[%s657_s24 + $0x1] sm:$0x1] %v325_v27 }
  0x58   : > { %335 = vst [vmem:[%s657_s24 + $0x2] sm:$0x1] %v334_v28  ;;  %344 = vst [vmem:[%s657_s24 + $0x3] sm:$0x1] %v343_v29 }
  0x59 PF: > { %s12_s11 = sadd.s32 1, %s588_s11   ;;  %s699_s9 = smov %s584_s10 }
  0x5a   : > { %p9_p5 = scmp.ge.s32.totalorder %s12_s11, 4   ;;  %s700_s10 = smov %s702_s12 }
  0x5c   :  { %11 = sbr.rel (!%p9_p5) target bundleno = 2 (0x2), region = 85 }

</bundles_post_ra>
